<compile_context>
chip_gen: v7x
topology: tpu7x:2x2x1
jax: 0.10.0
libtpu: 0.0.40
codegen_flags: <defaults>
</compile_context>

<pallas_src>
import jax
import jax.numpy as jnp
from jax.experimental import pallas as pl
from jax.experimental.pallas import tpu as pltpu

# ---- model sizes (small, consistent with the module's args) ----------------
SEQ_LEN = 4        # args.seq_length
NUM_NODES = 8      # maxNumPeds / len(look_up)
INPUT_SIZE = 2     # args.input_size (x, y)
EMBED = 16         # args.embedding_size
RNN = 32           # args.rnn_size
GRID = 4           # args.grid_size
G2 = GRID * GRID
OUT_SIZE = 5       # args.output_size (bivariate Gaussian params)
OUT_PAD = 128      # lane-dense padded output width
GATES = 4 * RNN               # 128
GE = G2 * EMBED               # 256
COMB_LANES = GE + GATES       # 384

# ---- packed constant-parameter slab layout (rows x COMB_LANES lanes) --------
# All section offsets are multiples of 8 rows (sublane-tile aligned).
ROW_W_COMB = 0        # (RNN, COMB_LANES)  = [w_ten_2d | w_hh]
ROW_W_IH_INP = 32     # (EMBED, GATES)
ROW_W_IH_TEN = 48     # (EMBED, GATES)
ROW_W_OUT = 64        # (RNN, OUT_PAD)     (padded to 128 output lanes)
ROW_W_IN = 96         # (INPUT_SIZE, EMBED)
ROW_B_IN = 104        # (1, EMBED)
ROW_B_TEN = 112       # (1, EMBED)
ROW_B_GATES = 120     # (1, GATES)         = b_ih + b_hh
ROW_B_OUT = 128       # (1, OUT_PAD)
SLAB_ROWS = 136


# ---- Pallas kernel: whole sequence in one invocation ------------------------
def social_lstm_kernel(x_ref, g_ref, h0_ref, c0_ref, slab_ref, out_ref, hc_ref):
    N, E, R = NUM_NODES, EMBED, RNN

    # ---- unpack the constant slab (one DMA; static slices, outside loop) ----
    w_comb   = slab_ref[ROW_W_COMB:ROW_W_COMB + R, :]                 # (R, 384)
    w_ih_inp = slab_ref[ROW_W_IH_INP:ROW_W_IH_INP + E, 0:GATES]       # (E, 4R)
    w_ih_ten = slab_ref[ROW_W_IH_TEN:ROW_W_IH_TEN + E, 0:GATES]       # (E, 4R)
    w_out    = slab_ref[ROW_W_OUT:ROW_W_OUT + R, 0:OUT_PAD]           # (R, 128)
    w_in     = slab_ref[ROW_W_IN:ROW_W_IN + INPUT_SIZE, 0:E]          # (2, E)
    b_in     = slab_ref[ROW_B_IN:ROW_B_IN + 1, 0:E]                   # (1, E)
    b_ten    = slab_ref[ROW_B_TEN:ROW_B_TEN + 1, 0:E]                 # (1, E)
    b_gates  = slab_ref[ROW_B_GATES:ROW_B_GATES + 1, 0:GATES]         # (1, 4R)
    b_out    = slab_ref[ROW_B_OUT:ROW_B_OUT + 1, 0:OUT_PAD]           # (1, 128)

    # ---- hoisted, non-recurrent input path (all frames at once) -------------
    x = x_ref[...]                                                    # (SEQ*N, 2)
    inp_emb = jnp.maximum(
        jnp.dot(x, w_in, preferred_element_type=jnp.float32) + b_in, 0.0)
    inp_gates = (jnp.dot(inp_emb, w_ih_inp,
                         preferred_element_type=jnp.float32)
                 + b_gates)                                           # (SEQ*N, 4R)

    h = h0_ref[...]                                                   # (N, R)
    c = c0_ref[...]                                                   # (N, R)

    # loop-invariant constants (hoisted)
    lane = jax.lax.broadcasted_iota(jnp.int32, (N, GATES), 1)
    g_cols = (lane >= 2 * R) & (lane < 3 * R)       # tanh (cell-gate) columns
    pre_scale = jnp.where(g_cols, 1.0, 0.5)         # sigmoid(x)=0.5*(tanh(x/2)+1)

    hs = []
    for t in range(SEQ_LEN):                        # static unroll (SEQ_LEN = 4)
        # fused recurrent-weight matmul: h @ [w_ten_2d | w_hh]
        hw_all = jnp.dot(h, w_comb, preferred_element_type=jnp.float32)  # (N, 384)

        # relayout (N, G2*E) -> (G2*N, E) so the (m, g) contraction with the
        # pre-flattened grid mask is a single lane-dense matmul.
        hw_rows = jnp.concatenate(
            [hw_all[:, g * E:(g + 1) * E] for g in range(G2)], axis=0)   # (G2*N, E)
        ten_pre = jnp.dot(g_ref[t], hw_rows,
                          preferred_element_type=jnp.float32) + b_ten    # (N, E)
        ten_emb = jnp.maximum(ten_pre, 0.0)      # ReLU; dropout = identity (eval)

        # LSTMCell gates (i, f, g, o) -- one f32 vreg
        gates = (inp_gates[t * N:(t + 1) * N, :]
                 + jnp.dot(ten_emb, w_ih_ten, preferred_element_type=jnp.float32)
                 + hw_all[:, GE:])                                       # (N, 4R)

        # single tanh pass: sigmoid columns via 0.5*(tanh(x/2)+1)
        th = jnp.tanh(gates * pre_scale)
        act = jnp.where(g_cols, th, 0.5 * th + 0.5)
        i_g = act[:, 0 * R:1 * R]
        f_g = act[:, 1 * R:2 * R]
        g_g = act[:, 2 * R:3 * R]
        o_g = act[:, 3 * R:4 * R]
        c = f_g * c + i_g * g_g
        h = o_g * jnp.tanh(c)
        hs.append(h)

    # ---- output layer hoisted out of the recurrence; lane-dense stores ------
    h_all = jnp.concatenate(hs, axis=0)                                  # (SEQ*N, R)
    out = jnp.dot(h_all, w_out, preferred_element_type=jnp.float32) + b_out
    out_ref[...] = out.astype(out_ref.dtype)                             # (SEQ*N, 128)
    hc_ref[...] = jnp.concatenate([h, c], axis=0).astype(hc_ref.dtype)   # (2N, R)


# ---- one-time (init-time) parameter packing ---------------------------------
def pack_params(params):
    """Pack all constant weights/biases into a single lane-padded VMEM slab.
    Done once at model init (hoisted out of the per-call forward path)."""
    (w_in, b_in, w_ten3, b_ten, w_ih, b_ih, w_hh, b_hh, w_out, b_out) = params
    R, E = RNN, EMBED
    # w_ten (G2, R, E) -> (R, G2*E): w2[r, g*E+e] = w_ten3[g, r, e]
    w2 = jnp.transpose(w_ten3, (1, 0, 2)).reshape(R, GE)
    w_comb = jnp.concatenate([w2, w_hh], axis=1)                    # (R, 384)

    slab = jnp.zeros((SLAB_ROWS, COMB_LANES), jnp.float32)
    slab = slab.at[ROW_W_COMB:ROW_W_COMB + R, :].set(w_comb)
    slab = slab.at[ROW_W_IH_INP:ROW_W_IH_INP + E, 0:GATES].set(w_ih[:E, :])
    slab = slab.at[ROW_W_IH_TEN:ROW_W_IH_TEN + E, 0:GATES].set(w_ih[E:, :])
    slab = slab.at[ROW_W_OUT:ROW_W_OUT + R, 0:OUT_SIZE].set(w_out)  # lane-pad
    slab = slab.at[ROW_W_IN:ROW_W_IN + INPUT_SIZE, 0:E].set(w_in)
    slab = slab.at[ROW_B_IN, 0:E].set(b_in[0])
    slab = slab.at[ROW_B_TEN, 0:E].set(b_ten[0])
    slab = slab.at[ROW_B_GATES, 0:GATES].set(b_ih[0] + b_hh[0])
    slab = slab.at[ROW_B_OUT, 0:OUT_SIZE].set(b_out[0])
    return slab


@jax.jit
def social_model_forward(input_data, grids, h0, c0, slab):
    """input_data: (SEQ, N, 2); grids: (SEQ, N, N, G2); slab from pack_params."""
    N = NUM_NODES
    # grids -> lane-dense (SEQ, N, G2*N): gflat[t, n, g*N+m] = grids[t, n, m, g]
    gflat = jnp.transpose(grids, (0, 1, 3, 2)).reshape(SEQ_LEN, N, G2 * N)
    x_flat = input_data.reshape(SEQ_LEN * N, INPUT_SIZE)

    vmem = pl.BlockSpec(memory_space=pltpu.MemorySpace.VMEM)
    out_pad, hc = pl.pallas_call(
        social_lstm_kernel,
        out_shape=(jax.ShapeDtypeStruct((SEQ_LEN * N, OUT_PAD), jnp.float32),
                   jax.ShapeDtypeStruct((2 * N, RNN), jnp.float32)),
        in_specs=[vmem] * 5,
        out_specs=(vmem, vmem),
    )(x_flat, gflat, h0, c0, slab)

    outs = out_pad[:, :OUT_SIZE].reshape(SEQ_LEN, N, OUT_SIZE)
    return outs, hc[:N], hc[N:]


# ---- pure-JAX reference for correctness -------------------------------------
def ref_forward(input_data, grids, h0, c0, params):
    (w_in, b_in, w_ten3, b_ten, w_ih, b_ih, w_hh, b_hh, w_out, b_out) = params
    w_ten = w_ten3.reshape(G2 * RNN, EMBED)
    h, c = h0, c0
    outs = []
    for t in range(SEQ_LEN):
        frame = input_data[t]
        gmask = grids[t]
        social = jnp.einsum('nmg,mr->ngr', gmask, h).reshape(NUM_NODES, -1)
        inp_emb = jax.nn.relu(frame @ w_in + b_in[0])
        ten_emb = jax.nn.relu(social @ w_ten + b_ten[0])
        concat = jnp.concatenate([inp_emb, ten_emb], axis=1)
        gates = concat @ w_ih + b_ih[0] + h @ w_hh + b_hh[0]
        i_g = jax.nn.sigmoid(gates[:, :RNN])
        f_g = jax.nn.sigmoid(gates[:, RNN:2 * RNN])
        g_g = jnp.tanh(gates[:, 2 * RNN:3 * RNN])
        o_g = jax.nn.sigmoid(gates[:, 3 * RNN:])
        c = f_g * c + i_g * g_g
        h = o_g * jnp.tanh(c)
        outs.append(h @ w_out + b_out[0])
    return jnp.stack(outs, axis=0), h, c


if __name__ == "__main__":
    key = jax.random.PRNGKey(0)
    keys = jax.random.split(key, 12)

    input_data = jax.random.normal(
        keys[0], (SEQ_LEN, NUM_NODES, INPUT_SIZE), jnp.float32)
    grids = (jax.random.uniform(
        keys[1], (SEQ_LEN, NUM_NODES, NUM_NODES, G2)) < 0.2).astype(jnp.float32)
    h0 = jnp.zeros((NUM_NODES, RNN), jnp.float32)
    c0 = jnp.zeros((NUM_NODES, RNN), jnp.float32)

    def init(k, shape, scale=0.1):
        return scale * jax.random.normal(k, shape, jnp.float32)

    params = (
        init(keys[2], (INPUT_SIZE, EMBED)),        # input_embedding_layer weight (in, out)
        init(keys[3], (1, EMBED)),                 # input_embedding_layer bias
        init(keys[4], (G2, RNN, EMBED)),           # tensor_embedding_layer weight (G2, R, E)
        init(keys[5], (1, EMBED)),                 # tensor_embedding_layer bias
        init(keys[6], (2 * EMBED, 4 * RNN)),       # LSTMCell weight_ih (in, 4*hidden)
        init(keys[7], (1, 4 * RNN)),               # LSTMCell bias_ih
        init(keys[8], (RNN, 4 * RNN)),             # LSTMCell weight_hh
        init(keys[9], (1, 4 * RNN)),               # LSTMCell bias_hh
        init(keys[10], (RNN, OUT_SIZE)),           # output_layer weight
        init(keys[11], (1, OUT_SIZE)),             # output_layer bias
    )

    # one-time weight packing (hoisted out of the per-call forward path)
    slab = jax.block_until_ready(pack_params(params))

    outs, h_fin, c_fin = social_model_forward(input_data, grids, h0, c0, slab)
    jax.block_until_ready((outs, h_fin, c_fin))

    ref_outs, ref_h, ref_c = ref_forward(input_data, grids, h0, c0, params)
    assert jnp.allclose(outs, ref_outs, atol=1e-3, rtol=1e-3)
    assert jnp.allclose(h_fin, ref_h, atol=1e-3, rtol=1e-3)
    assert jnp.allclose(c_fin, ref_c, atol=1e-3, rtol=1e-3)

    print("KERNEL_OK")
</pallas_src>

<mosaic_0001>
module attributes {stable_mosaic.version = 11 : i64} {
  func.func @social_lstm_kernel(%arg0: memref<32x2xf32, #tpu.memory_space<vmem>>, %arg1: memref<4x8x128xf32, #tpu.memory_space<vmem>>, %arg2: memref<8x32xf32, #tpu.memory_space<vmem>>, %arg3: memref<8x32xf32, #tpu.memory_space<vmem>>, %arg4: memref<136x384xf32, #tpu.memory_space<vmem>>, %arg5: memref<32x128xf32, #tpu.memory_space<vmem>>, %arg6: memref<16x32xf32, #tpu.memory_space<vmem>>) attributes {dimension_semantics = [], scalar_prefetch = 0 : i64, scratch_operands = 0 : i64, tpu.core_type = #tpu.core_type<tc>} {
    %c0 = arith.constant 0 : index
    %c0_0 = arith.constant 0 : index
    %0 = vector.load %arg4[%c0, %c0_0] : memref<136x384xf32, #tpu.memory_space<vmem>>, vector<32x384xf32>
    %c32 = arith.constant 32 : index
    %c0_1 = arith.constant 0 : index
    %1 = vector.load %arg4[%c32, %c0_1] : memref<136x384xf32, #tpu.memory_space<vmem>>, vector<16x128xf32>
    %c48 = arith.constant 48 : index
    %c0_2 = arith.constant 0 : index
    %2 = vector.load %arg4[%c48, %c0_2] : memref<136x384xf32, #tpu.memory_space<vmem>>, vector<16x128xf32>
    %c64 = arith.constant 64 : index
    %c0_3 = arith.constant 0 : index
    %3 = vector.load %arg4[%c64, %c0_3] : memref<136x384xf32, #tpu.memory_space<vmem>>, vector<32x128xf32>
    %c96 = arith.constant 96 : index
    %c0_4 = arith.constant 0 : index
    %4 = vector.load %arg4[%c96, %c0_4] : memref<136x384xf32, #tpu.memory_space<vmem>>, vector<2x16xf32>
    %c104 = arith.constant 104 : index
    %c0_5 = arith.constant 0 : index
    %5 = vector.load %arg4[%c104, %c0_5] : memref<136x384xf32, #tpu.memory_space<vmem>>, vector<1x16xf32>
    %c112 = arith.constant 112 : index
    %c0_6 = arith.constant 0 : index
    %6 = vector.load %arg4[%c112, %c0_6] : memref<136x384xf32, #tpu.memory_space<vmem>>, vector<1x16xf32>
    %c120 = arith.constant 120 : index
    %c0_7 = arith.constant 0 : index
    %7 = vector.load %arg4[%c120, %c0_7] : memref<136x384xf32, #tpu.memory_space<vmem>>, vector<1x128xf32>
    %c128 = arith.constant 128 : index
    %c0_8 = arith.constant 0 : index
    %8 = vector.load %arg4[%c128, %c0_8] : memref<136x384xf32, #tpu.memory_space<vmem>>, vector<1x128xf32>
    %c0_9 = arith.constant 0 : index
    %c0_10 = arith.constant 0 : index
    %9 = vector.load %arg0[%c0_9, %c0_10] : memref<32x2xf32, #tpu.memory_space<vmem>>, vector<32x2xf32>
    %cst = arith.constant dense<0.000000e+00> : vector<32x16xf32>
    %10 = tpu.matmul %9, %4, %cst {dimension_numbers = #tpu.dot_dimension_numbers<[1], [0], [0], [1], [0, 0, 1, 1], [], []>} : vector<32x2xf32>, vector<2x16xf32>, vector<32x16xf32> -> vector<32x16xf32>
    %11 = vector.broadcast %5 : vector<1x16xf32> to vector<32x16xf32>
    %12 = arith.addf %10, %11 : vector<32x16xf32>
    %cst_11 = arith.constant 0.000000e+00 : f32
    %13 = vector.broadcast %cst_11 : f32 to vector<32x16xf32>
    %14 = arith.maximumf %12, %13 : vector<32x16xf32>
    %cst_12 = arith.constant dense<0.000000e+00> : vector<32x128xf32>
    %15 = tpu.matmul %14, %1, %cst_12 {dimension_numbers = #tpu.dot_dimension_numbers<[1], [0], [0], [1], [0, 0, 1, 1], [], []>} : vector<32x16xf32>, vector<16x128xf32>, vector<32x128xf32> -> vector<32x128xf32>
    %16 = vector.broadcast %7 : vector<1x128xf32> to vector<32x128xf32>
    %17 = arith.addf %15, %16 : vector<32x128xf32>
    %c0_13 = arith.constant 0 : index
    %c0_14 = arith.constant 0 : index
    %18 = vector.load %arg2[%c0_13, %c0_14] : memref<8x32xf32, #tpu.memory_space<vmem>>, vector<8x32xf32>
    %c0_15 = arith.constant 0 : index
    %c0_16 = arith.constant 0 : index
    %19 = vector.load %arg3[%c0_15, %c0_16] : memref<8x32xf32, #tpu.memory_space<vmem>>, vector<8x32xf32>
    %20 = tpu.iota {dimensions = array<i32: 1>} : vector<8x128xi32>
    %c64_i32 = arith.constant 64 : i32
    %21 = vector.broadcast %c64_i32 : i32 to vector<8x128xi32>
    %22 = arith.cmpi sge, %20, %21 : vector<8x128xi32>
    %c96_i32 = arith.constant 96 : i32
    %23 = vector.broadcast %c96_i32 : i32 to vector<8x128xi32>
    %24 = arith.cmpi slt, %20, %23 : vector<8x128xi32>
    %25 = arith.andi %22, %24 : vector<8x128xi1>
    %cst_17 = arith.constant 1.000000e+00 : f32
    %cst_18 = arith.constant 5.000000e-01 : f32
    %26 = vector.broadcast %cst_17 : f32 to vector<8x128xf32>
    %27 = vector.broadcast %cst_18 : f32 to vector<8x128xf32>
    %28 = arith.select %25, %26, %27 : vector<8x128xi1>, vector<8x128xf32>
    %cst_19 = arith.constant dense<0.000000e+00> : vector<8x384xf32>
    %29 = tpu.matmul %18, %0, %cst_19 {dimension_numbers = #tpu.dot_dimension_numbers<[1], [0], [0], [1], [0, 0, 1, 1], [], []>} : vector<8x32xf32>, vector<32x384xf32>, vector<8x384xf32> -> vector<8x384xf32>
    %30 = vector.extract_strided_slice %29 {offsets = [0, 0], sizes = [8, 16], strides = [1, 1]} : vector<8x384xf32> to vector<8x16xf32>
    %31 = vector.extract_strided_slice %29 {offsets = [0, 16], sizes = [8, 16], strides = [1, 1]} : vector<8x384xf32> to vector<8x16xf32>
    %32 = vector.extract_strided_slice %29 {offsets = [0, 32], sizes = [8, 16], strides = [1, 1]} : vector<8x384xf32> to vector<8x16xf32>
    %33 = vector.extract_strided_slice %29 {offsets = [0, 48], sizes = [8, 16], strides = [1, 1]} : vector<8x384xf32> to vector<8x16xf32>
    %34 = vector.extract_strided_slice %29 {offsets = [0, 64], sizes = [8, 16], strides = [1, 1]} : vector<8x384xf32> to vector<8x16xf32>
    %35 = vector.extract_strided_slice %29 {offsets = [0, 80], sizes = [8, 16], strides = [1, 1]} : vector<8x384xf32> to vector<8x16xf32>
    %36 = vector.extract_strided_slice %29 {offsets = [0, 96], sizes = [8, 16], strides = [1, 1]} : vector<8x384xf32> to vector<8x16xf32>
    %37 = vector.extract_strided_slice %29 {offsets = [0, 112], sizes = [8, 16], strides = [1, 1]} : vector<8x384xf32> to vector<8x16xf32>
    %38 = vector.extract_strided_slice %29 {offsets = [0, 128], sizes = [8, 16], strides = [1, 1]} : vector<8x384xf32> to vector<8x16xf32>
    %39 = vector.extract_strided_slice %29 {offsets = [0, 144], sizes = [8, 16], strides = [1, 1]} : vector<8x384xf32> to vector<8x16xf32>
    %40 = vector.extract_strided_slice %29 {offsets = [0, 160], sizes = [8, 16], strides = [1, 1]} : vector<8x384xf32> to vector<8x16xf32>
    %41 = vector.extract_strided_slice %29 {offsets = [0, 176], sizes = [8, 16], strides = [1, 1]} : vector<8x384xf32> to vector<8x16xf32>
    %42 = vector.extract_strided_slice %29 {offsets = [0, 192], sizes = [8, 16], strides = [1, 1]} : vector<8x384xf32> to vector<8x16xf32>
    %43 = vector.extract_strided_slice %29 {offsets = [0, 208], sizes = [8, 16], strides = [1, 1]} : vector<8x384xf32> to vector<8x16xf32>
    %44 = vector.extract_strided_slice %29 {offsets = [0, 224], sizes = [8, 16], strides = [1, 1]} : vector<8x384xf32> to vector<8x16xf32>
    %45 = vector.extract_strided_slice %29 {offsets = [0, 240], sizes = [8, 16], strides = [1, 1]} : vector<8x384xf32> to vector<8x16xf32>
    %46 = tpu.concatenate %30, %31, %32, %33, %34, %35, %36, %37, %38, %39, %40, %41, %42, %43, %44, %45 in 0 : vector<8x16xf32>, vector<8x16xf32>, vector<8x16xf32>, vector<8x16xf32>, vector<8x16xf32>, vector<8x16xf32>, vector<8x16xf32>, vector<8x16xf32>, vector<8x16xf32>, vector<8x16xf32>, vector<8x16xf32>, vector<8x16xf32>, vector<8x16xf32>, vector<8x16xf32>, vector<8x16xf32>, vector<8x16xf32> -> vector<128x16xf32>
    %c0_20 = arith.constant 0 : index
    %c0_21 = arith.constant 0 : index
    %c0_22 = arith.constant 0 : index
    %47 = vector.load %arg1[%c0_20, %c0_21, %c0_22] : memref<4x8x128xf32, #tpu.memory_space<vmem>>, vector<1x8x128xf32>
    %48 = vector.shape_cast %47 : vector<1x8x128xf32> to vector<8x128xf32>
    %cst_23 = arith.constant dense<0.000000e+00> : vector<8x16xf32>
    %49 = tpu.matmul %48, %46, %cst_23 {dimension_numbers = #tpu.dot_dimension_numbers<[1], [0], [0], [1], [0, 0, 1, 1], [], []>} : vector<8x128xf32>, vector<128x16xf32>, vector<8x16xf32> -> vector<8x16xf32>
    %50 = vector.broadcast %6 : vector<1x16xf32> to vector<8x16xf32>
    %51 = arith.addf %49, %50 : vector<8x16xf32>
    %cst_24 = arith.constant 0.000000e+00 : f32
    %52 = vector.broadcast %cst_24 : f32 to vector<8x16xf32>
    %53 = arith.maximumf %51, %52 : vector<8x16xf32>
    %54 = vector.extract_strided_slice %17 {offsets = [0, 0], sizes = [8, 128], strides = [1, 1]} : vector<32x128xf32> to vector<8x128xf32>
    %cst_25 = arith.constant dense<0.000000e+00> : vector<8x128xf32>
    %55 = tpu.matmul %53, %2, %cst_25 {dimension_numbers = #tpu.dot_dimension_numbers<[1], [0], [0], [1], [0, 0, 1, 1], [], []>} : vector<8x16xf32>, vector<16x128xf32>, vector<8x128xf32> -> vector<8x128xf32>
    %56 = arith.addf %54, %55 : vector<8x128xf32>
    %57 = vector.extract_strided_slice %29 {offsets = [0, 256], sizes = [8, 128], strides = [1, 1]} : vector<8x384xf32> to vector<8x128xf32>
    %58 = arith.addf %56, %57 : vector<8x128xf32>
    %59 = arith.mulf %58, %28 : vector<8x128xf32>
    %60 = math.tanh %59 : vector<8x128xf32>
    %cst_26 = arith.constant 5.000000e-01 : f32
    %61 = vector.broadcast %cst_26 : f32 to vector<8x128xf32>
    %62 = arith.mulf %61, %60 : vector<8x128xf32>
    %cst_27 = arith.constant 5.000000e-01 : f32
    %63 = vector.broadcast %cst_27 : f32 to vector<8x128xf32>
    %64 = arith.addf %62, %63 : vector<8x128xf32>
    %65 = arith.select %25, %60, %64 : vector<8x128xi1>, vector<8x128xf32>
    %66 = vector.extract_strided_slice %65 {offsets = [0, 0], sizes = [8, 32], strides = [1, 1]} : vector<8x128xf32> to vector<8x32xf32>
    %67 = vector.extract_strided_slice %65 {offsets = [0, 32], sizes = [8, 32], strides = [1, 1]} : vector<8x128xf32> to vector<8x32xf32>
    %68 = vector.extract_strided_slice %65 {offsets = [0, 64], sizes = [8, 32], strides = [1, 1]} : vector<8x128xf32> to vector<8x32xf32>
    %69 = vector.extract_strided_slice %65 {offsets = [0, 96], sizes = [8, 32], strides = [1, 1]} : vector<8x128xf32> to vector<8x32xf32>
    %70 = arith.mulf %67, %19 : vector<8x32xf32>
    %71 = arith.mulf %66, %68 : vector<8x32xf32>
    %72 = arith.addf %70, %71 : vector<8x32xf32>
    %73 = math.tanh %72 : vector<8x32xf32>
    %74 = arith.mulf %69, %73 : vector<8x32xf32>
    %cst_28 = arith.constant dense<0.000000e+00> : vector<8x384xf32>
    %75 = tpu.matmul %74, %0, %cst_28 {dimension_numbers = #tpu.dot_dimension_numbers<[1], [0], [0], [1], [0, 0, 1, 1], [], []>} : vector<8x32xf32>, vector<32x384xf32>, vector<8x384xf32> -> vector<8x384xf32>
    %76 = vector.extract_strided_slice %75 {offsets = [0, 0], sizes = [8, 16], strides = [1, 1]} : vector<8x384xf32> to vector<8x16xf32>
    %77 = vector.extract_strided_slice %75 {offsets = [0, 16], sizes = [8, 16], strides = [1, 1]} : vector<8x384xf32> to vector<8x16xf32>
    %78 = vector.extract_strided_slice %75 {offsets = [0, 32], sizes = [8, 16], strides = [1, 1]} : vector<8x384xf32> to vector<8x16xf32>
    %79 = vector.extract_strided_slice %75 {offsets = [0, 48], sizes = [8, 16], strides = [1, 1]} : vector<8x384xf32> to vector<8x16xf32>
    %80 = vector.extract_strided_slice %75 {offsets = [0, 64], sizes = [8, 16], strides = [1, 1]} : vector<8x384xf32> to vector<8x16xf32>
    %81 = vector.extract_strided_slice %75 {offsets = [0, 80], sizes = [8, 16], strides = [1, 1]} : vector<8x384xf32> to vector<8x16xf32>
    %82 = vector.extract_strided_slice %75 {offsets = [0, 96], sizes = [8, 16], strides = [1, 1]} : vector<8x384xf32> to vector<8x16xf32>
    %83 = vector.extract_strided_slice %75 {offsets = [0, 112], sizes = [8, 16], strides = [1, 1]} : vector<8x384xf32> to vector<8x16xf32>
    %84 = vector.extract_strided_slice %75 {offsets = [0, 128], sizes = [8, 16], strides = [1, 1]} : vector<8x384xf32> to vector<8x16xf32>
    %85 = vector.extract_strided_slice %75 {offsets = [0, 144], sizes = [8, 16], strides = [1, 1]} : vector<8x384xf32> to vector<8x16xf32>
    %86 = vector.extract_strided_slice %75 {offsets = [0, 160], sizes = [8, 16], strides = [1, 1]} : vector<8x384xf32> to vector<8x16xf32>
    %87 = vector.extract_strided_slice %75 {offsets = [0, 176], sizes = [8, 16], strides = [1, 1]} : vector<8x384xf32> to vector<8x16xf32>
    %88 = vector.extract_strided_slice %75 {offsets = [0, 192], sizes = [8, 16], strides = [1, 1]} : vector<8x384xf32> to vector<8x16xf32>
    %89 = vector.extract_strided_slice %75 {offsets = [0, 208], sizes = [8, 16], strides = [1, 1]} : vector<8x384xf32> to vector<8x16xf32>
    %90 = vector.extract_strided_slice %75 {offsets = [0, 224], sizes = [8, 16], strides = [1, 1]} : vector<8x384xf32> to vector<8x16xf32>
    %91 = vector.extract_strided_slice %75 {offsets = [0, 240], sizes = [8, 16], strides = [1, 1]} : vector<8x384xf32> to vector<8x16xf32>
    %92 = tpu.concatenate %76, %77, %78, %79, %80, %81, %82, %83, %84, %85, %86, %87, %88, %89, %90, %91 in 0 : vector<8x16xf32>, vector<8x16xf32>, vector<8x16xf32>, vector<8x16xf32>, vector<8x16xf32>, vector<8x16xf32>, vector<8x16xf32>, vector<8x16xf32>, vector<8x16xf32>, vector<8x16xf32>, vector<8x16xf32>, vector<8x16xf32>, vector<8x16xf32>, vector<8x16xf32>, vector<8x16xf32>, vector<8x16xf32> -> vector<128x16xf32>
    %c1 = arith.constant 1 : index
    %c0_29 = arith.constant 0 : index
    %c0_30 = arith.constant 0 : index
    %93 = vector.load %arg1[%c1, %c0_29, %c0_30] : memref<4x8x128xf32, #tpu.memory_space<vmem>>, vector<1x8x128xf32>
    %94 = vector.shape_cast %93 : vector<1x8x128xf32> to vector<8x128xf32>
    %cst_31 = arith.constant dense<0.000000e+00> : vector<8x16xf32>
    %95 = tpu.matmul %94, %92, %cst_31 {dimension_numbers = #tpu.dot_dimension_numbers<[1], [0], [0], [1], [0, 0, 1, 1], [], []>} : vector<8x128xf32>, vector<128x16xf32>, vector<8x16xf32> -> vector<8x16xf32>
    %96 = vector.broadcast %6 : vector<1x16xf32> to vector<8x16xf32>
    %97 = arith.addf %95, %96 : vector<8x16xf32>
    %cst_32 = arith.constant 0.000000e+00 : f32
    %98 = vector.broadcast %cst_32 : f32 to vector<8x16xf32>
    %99 = arith.maximumf %97, %98 : vector<8x16xf32>
    %100 = vector.extract_strided_slice %17 {offsets = [8, 0], sizes = [8, 128], strides = [1, 1]} : vector<32x128xf32> to vector<8x128xf32>
    %cst_33 = arith.constant dense<0.000000e+00> : vector<8x128xf32>
    %101 = tpu.matmul %99, %2, %cst_33 {dimension_numbers = #tpu.dot_dimension_numbers<[1], [0], [0], [1], [0, 0, 1, 1], [], []>} : vector<8x16xf32>, vector<16x128xf32>, vector<8x128xf32> -> vector<8x128xf32>
    %102 = arith.addf %100, %101 : vector<8x128xf32>
    %103 = vector.extract_strided_slice %75 {offsets = [0, 256], sizes = [8, 128], strides = [1, 1]} : vector<8x384xf32> to vector<8x128xf32>
    %104 = arith.addf %102, %103 : vector<8x128xf32>
    %105 = arith.mulf %104, %28 : vector<8x128xf32>
    %106 = math.tanh %105 : vector<8x128xf32>
    %cst_34 = arith.constant 5.000000e-01 : f32
    %107 = vector.broadcast %cst_34 : f32 to vector<8x128xf32>
    %108 = arith.mulf %107, %106 : vector<8x128xf32>
    %cst_35 = arith.constant 5.000000e-01 : f32
    %109 = vector.broadcast %cst_35 : f32 to vector<8x128xf32>
    %110 = arith.addf %108, %109 : vector<8x128xf32>
    %111 = arith.select %25, %106, %110 : vector<8x128xi1>, vector<8x128xf32>
    %112 = vector.extract_strided_slice %111 {offsets = [0, 0], sizes = [8, 32], strides = [1, 1]} : vector<8x128xf32> to vector<8x32xf32>
    %113 = vector.extract_strided_slice %111 {offsets = [0, 32], sizes = [8, 32], strides = [1, 1]} : vector<8x128xf32> to vector<8x32xf32>
    %114 = vector.extract_strided_slice %111 {offsets = [0, 64], sizes = [8, 32], strides = [1, 1]} : vector<8x128xf32> to vector<8x32xf32>
    %115 = vector.extract_strided_slice %111 {offsets = [0, 96], sizes = [8, 32], strides = [1, 1]} : vector<8x128xf32> to vector<8x32xf32>
    %116 = arith.mulf %113, %72 : vector<8x32xf32>
    %117 = arith.mulf %112, %114 : vector<8x32xf32>
    %118 = arith.addf %116, %117 : vector<8x32xf32>
    %119 = math.tanh %118 : vector<8x32xf32>
    %120 = arith.mulf %115, %119 : vector<8x32xf32>
    %cst_36 = arith.constant dense<0.000000e+00> : vector<8x384xf32>
    %121 = tpu.matmul %120, %0, %cst_36 {dimension_numbers = #tpu.dot_dimension_numbers<[1], [0], [0], [1], [0, 0, 1, 1], [], []>} : vector<8x32xf32>, vector<32x384xf32>, vector<8x384xf32> -> vector<8x384xf32>
    %122 = vector.extract_strided_slice %121 {offsets = [0, 0], sizes = [8, 16], strides = [1, 1]} : vector<8x384xf32> to vector<8x16xf32>
    %123 = vector.extract_strided_slice %121 {offsets = [0, 16], sizes = [8, 16], strides = [1, 1]} : vector<8x384xf32> to vector<8x16xf32>
    %124 = vector.extract_strided_slice %121 {offsets = [0, 32], sizes = [8, 16], strides = [1, 1]} : vector<8x384xf32> to vector<8x16xf32>
    %125 = vector.extract_strided_slice %121 {offsets = [0, 48], sizes = [8, 16], strides = [1, 1]} : vector<8x384xf32> to vector<8x16xf32>
    %126 = vector.extract_strided_slice %121 {offsets = [0, 64], sizes = [8, 16], strides = [1, 1]} : vector<8x384xf32> to vector<8x16xf32>
    %127 = vector.extract_strided_slice %121 {offsets = [0, 80], sizes = [8, 16], strides = [1, 1]} : vector<8x384xf32> to vector<8x16xf32>
    %128 = vector.extract_strided_slice %121 {offsets = [0, 96], sizes = [8, 16], strides = [1, 1]} : vector<8x384xf32> to vector<8x16xf32>
    %129 = vector.extract_strided_slice %121 {offsets = [0, 112], sizes = [8, 16], strides = [1, 1]} : vector<8x384xf32> to vector<8x16xf32>
    %130 = vector.extract_strided_slice %121 {offsets = [0, 128], sizes = [8, 16], strides = [1, 1]} : vector<8x384xf32> to vector<8x16xf32>
    %131 = vector.extract_strided_slice %121 {offsets = [0, 144], sizes = [8, 16], strides = [1, 1]} : vector<8x384xf32> to vector<8x16xf32>
    %132 = vector.extract_strided_slice %121 {offsets = [0, 160], sizes = [8, 16], strides = [1, 1]} : vector<8x384xf32> to vector<8x16xf32>
    %133 = vector.extract_strided_slice %121 {offsets = [0, 176], sizes = [8, 16], strides = [1, 1]} : vector<8x384xf32> to vector<8x16xf32>
    %134 = vector.extract_strided_slice %121 {offsets = [0, 192], sizes = [8, 16], strides = [1, 1]} : vector<8x384xf32> to vector<8x16xf32>
    %135 = vector.extract_strided_slice %121 {offsets = [0, 208], sizes = [8, 16], strides = [1, 1]} : vector<8x384xf32> to vector<8x16xf32>
    %136 = vector.extract_strided_slice %121 {offsets = [0, 224], sizes = [8, 16], strides = [1, 1]} : vector<8x384xf32> to vector<8x16xf32>
    %137 = vector.extract_strided_slice %121 {offsets = [0, 240], sizes = [8, 16], strides = [1, 1]} : vector<8x384xf32> to vector<8x16xf32>
    %138 = tpu.concatenate %122, %123, %124, %125, %126, %127, %128, %129, %130, %131, %132, %133, %134, %135, %136, %137 in 0 : vector<8x16xf32>, vector<8x16xf32>, vector<8x16xf32>, vector<8x16xf32>, vector<8x16xf32>, vector<8x16xf32>, vector<8x16xf32>, vector<8x16xf32>, vector<8x16xf32>, vector<8x16xf32>, vector<8x16xf32>, vector<8x16xf32>, vector<8x16xf32>, vector<8x16xf32>, vector<8x16xf32>, vector<8x16xf32> -> vector<128x16xf32>
    %c2 = arith.constant 2 : index
    %c0_37 = arith.constant 0 : index
    %c0_38 = arith.constant 0 : index
    %139 = vector.load %arg1[%c2, %c0_37, %c0_38] : memref<4x8x128xf32, #tpu.memory_space<vmem>>, vector<1x8x128xf32>
    %140 = vector.shape_cast %139 : vector<1x8x128xf32> to vector<8x128xf32>
    %cst_39 = arith.constant dense<0.000000e+00> : vector<8x16xf32>
    %141 = tpu.matmul %140, %138, %cst_39 {dimension_numbers = #tpu.dot_dimension_numbers<[1], [0], [0], [1], [0, 0, 1, 1], [], []>} : vector<8x128xf32>, vector<128x16xf32>, vector<8x16xf32> -> vector<8x16xf32>
    %142 = vector.broadcast %6 : vector<1x16xf32> to vector<8x16xf32>
    %143 = arith.addf %141, %142 : vector<8x16xf32>
    %cst_40 = arith.constant 0.000000e+00 : f32
    %144 = vector.broadcast %cst_40 : f32 to vector<8x16xf32>
    %145 = arith.maximumf %143, %144 : vector<8x16xf32>
    %146 = vector.extract_strided_slice %17 {offsets = [16, 0], sizes = [8, 128], strides = [1, 1]} : vector<32x128xf32> to vector<8x128xf32>
    %cst_41 = arith.constant dense<0.000000e+00> : vector<8x128xf32>
    %147 = tpu.matmul %145, %2, %cst_41 {dimension_numbers = #tpu.dot_dimension_numbers<[1], [0], [0], [1], [0, 0, 1, 1], [], []>} : vector<8x16xf32>, vector<16x128xf32>, vector<8x128xf32> -> vector<8x128xf32>
    %148 = arith.addf %146, %147 : vector<8x128xf32>
    %149 = vector.extract_strided_slice %121 {offsets = [0, 256], sizes = [8, 128], strides = [1, 1]} : vector<8x384xf32> to vector<8x128xf32>
    %150 = arith.addf %148, %149 : vector<8x128xf32>
    %151 = arith.mulf %150, %28 : vector<8x128xf32>
    %152 = math.tanh %151 : vector<8x128xf32>
    %cst_42 = arith.constant 5.000000e-01 : f32
    %153 = vector.broadcast %cst_42 : f32 to vector<8x128xf32>
    %154 = arith.mulf %153, %152 : vector<8x128xf32>
    %cst_43 = arith.constant 5.000000e-01 : f32
    %155 = vector.broadcast %cst_43 : f32 to vector<8x128xf32>
    %156 = arith.addf %154, %155 : vector<8x128xf32>
    %157 = arith.select %25, %152, %156 : vector<8x128xi1>, vector<8x128xf32>
    %158 = vector.extract_strided_slice %157 {offsets = [0, 0], sizes = [8, 32], strides = [1, 1]} : vector<8x128xf32> to vector<8x32xf32>
    %159 = vector.extract_strided_slice %157 {offsets = [0, 32], sizes = [8, 32], strides = [1, 1]} : vector<8x128xf32> to vector<8x32xf32>
    %160 = vector.extract_strided_slice %157 {offsets = [0, 64], sizes = [8, 32], strides = [1, 1]} : vector<8x128xf32> to vector<8x32xf32>
    %161 = vector.extract_strided_slice %157 {offsets = [0, 96], sizes = [8, 32], strides = [1, 1]} : vector<8x128xf32> to vector<8x32xf32>
    %162 = arith.mulf %159, %118 : vector<8x32xf32>
    %163 = arith.mulf %158, %160 : vector<8x32xf32>
    %164 = arith.addf %162, %163 : vector<8x32xf32>
    %165 = math.tanh %164 : vector<8x32xf32>
    %166 = arith.mulf %161, %165 : vector<8x32xf32>
    %cst_44 = arith.constant dense<0.000000e+00> : vector<8x384xf32>
    %167 = tpu.matmul %166, %0, %cst_44 {dimension_numbers = #tpu.dot_dimension_numbers<[1], [0], [0], [1], [0, 0, 1, 1], [], []>} : vector<8x32xf32>, vector<32x384xf32>, vector<8x384xf32> -> vector<8x384xf32>
    %168 = vector.extract_strided_slice %167 {offsets = [0, 0], sizes = [8, 16], strides = [1, 1]} : vector<8x384xf32> to vector<8x16xf32>
    %169 = vector.extract_strided_slice %167 {offsets = [0, 16], sizes = [8, 16], strides = [1, 1]} : vector<8x384xf32> to vector<8x16xf32>
    %170 = vector.extract_strided_slice %167 {offsets = [0, 32], sizes = [8, 16], strides = [1, 1]} : vector<8x384xf32> to vector<8x16xf32>
    %171 = vector.extract_strided_slice %167 {offsets = [0, 48], sizes = [8, 16], strides = [1, 1]} : vector<8x384xf32> to vector<8x16xf32>
    %172 = vector.extract_strided_slice %167 {offsets = [0, 64], sizes = [8, 16], strides = [1, 1]} : vector<8x384xf32> to vector<8x16xf32>
    %173 = vector.extract_strided_slice %167 {offsets = [0, 80], sizes = [8, 16], strides = [1, 1]} : vector<8x384xf32> to vector<8x16xf32>
    %174 = vector.extract_strided_slice %167 {offsets = [0, 96], sizes = [8, 16], strides = [1, 1]} : vector<8x384xf32> to vector<8x16xf32>
    %175 = vector.extract_strided_slice %167 {offsets = [0, 112], sizes = [8, 16], strides = [1, 1]} : vector<8x384xf32> to vector<8x16xf32>
    %176 = vector.extract_strided_slice %167 {offsets = [0, 128], sizes = [8, 16], strides = [1, 1]} : vector<8x384xf32> to vector<8x16xf32>
    %177 = vector.extract_strided_slice %167 {offsets = [0, 144], sizes = [8, 16], strides = [1, 1]} : vector<8x384xf32> to vector<8x16xf32>
    %178 = vector.extract_strided_slice %167 {offsets = [0, 160], sizes = [8, 16], strides = [1, 1]} : vector<8x384xf32> to vector<8x16xf32>
    %179 = vector.extract_strided_slice %167 {offsets = [0, 176], sizes = [8, 16], strides = [1, 1]} : vector<8x384xf32> to vector<8x16xf32>
    %180 = vector.extract_strided_slice %167 {offsets = [0, 192], sizes = [8, 16], strides = [1, 1]} : vector<8x384xf32> to vector<8x16xf32>
    %181 = vector.extract_strided_slice %167 {offsets = [0, 208], sizes = [8, 16], strides = [1, 1]} : vector<8x384xf32> to vector<8x16xf32>
    %182 = vector.extract_strided_slice %167 {offsets = [0, 224], sizes = [8, 16], strides = [1, 1]} : vector<8x384xf32> to vector<8x16xf32>
    %183 = vector.extract_strided_slice %167 {offsets = [0, 240], sizes = [8, 16], strides = [1, 1]} : vector<8x384xf32> to vector<8x16xf32>
    %184 = tpu.concatenate %168, %169, %170, %171, %172, %173, %174, %175, %176, %177, %178, %179, %180, %181, %182, %183 in 0 : vector<8x16xf32>, vector<8x16xf32>, vector<8x16xf32>, vector<8x16xf32>, vector<8x16xf32>, vector<8x16xf32>, vector<8x16xf32>, vector<8x16xf32>, vector<8x16xf32>, vector<8x16xf32>, vector<8x16xf32>, vector<8x16xf32>, vector<8x16xf32>, vector<8x16xf32>, vector<8x16xf32>, vector<8x16xf32> -> vector<128x16xf32>
    %c3 = arith.constant 3 : index
    %c0_45 = arith.constant 0 : index
    %c0_46 = arith.constant 0 : index
    %185 = vector.load %arg1[%c3, %c0_45, %c0_46] : memref<4x8x128xf32, #tpu.memory_space<vmem>>, vector<1x8x128xf32>
    %186 = vector.shape_cast %185 : vector<1x8x128xf32> to vector<8x128xf32>
    %cst_47 = arith.constant dense<0.000000e+00> : vector<8x16xf32>
    %187 = tpu.matmul %186, %184, %cst_47 {dimension_numbers = #tpu.dot_dimension_numbers<[1], [0], [0], [1], [0, 0, 1, 1], [], []>} : vector<8x128xf32>, vector<128x16xf32>, vector<8x16xf32> -> vector<8x16xf32>
    %188 = vector.broadcast %6 : vector<1x16xf32> to vector<8x16xf32>
    %189 = arith.addf %187, %188 : vector<8x16xf32>
    %cst_48 = arith.constant 0.000000e+00 : f32
    %190 = vector.broadcast %cst_48 : f32 to vector<8x16xf32>
    %191 = arith.maximumf %189, %190 : vector<8x16xf32>
    %192 = vector.extract_strided_slice %17 {offsets = [24, 0], sizes = [8, 128], strides = [1, 1]} : vector<32x128xf32> to vector<8x128xf32>
    %cst_49 = arith.constant dense<0.000000e+00> : vector<8x128xf32>
    %193 = tpu.matmul %191, %2, %cst_49 {dimension_numbers = #tpu.dot_dimension_numbers<[1], [0], [0], [1], [0, 0, 1, 1], [], []>} : vector<8x16xf32>, vector<16x128xf32>, vector<8x128xf32> -> vector<8x128xf32>
    %194 = arith.addf %192, %193 : vector<8x128xf32>
    %195 = vector.extract_strided_slice %167 {offsets = [0, 256], sizes = [8, 128], strides = [1, 1]} : vector<8x384xf32> to vector<8x128xf32>
    %196 = arith.addf %194, %195 : vector<8x128xf32>
    %197 = arith.mulf %196, %28 : vector<8x128xf32>
    %198 = math.tanh %197 : vector<8x128xf32>
    %cst_50 = arith.constant 5.000000e-01 : f32
    %199 = vector.broadcast %cst_50 : f32 to vector<8x128xf32>
    %200 = arith.mulf %199, %198 : vector<8x128xf32>
    %cst_51 = arith.constant 5.000000e-01 : f32
    %201 = vector.broadcast %cst_51 : f32 to vector<8x128xf32>
    %202 = arith.addf %200, %201 : vector<8x128xf32>
    %203 = arith.select %25, %198, %202 : vector<8x128xi1>, vector<8x128xf32>
    %204 = vector.extract_strided_slice %203 {offsets = [0, 0], sizes = [8, 32], strides = [1, 1]} : vector<8x128xf32> to vector<8x32xf32>
    %205 = vector.extract_strided_slice %203 {offsets = [0, 32], sizes = [8, 32], strides = [1, 1]} : vector<8x128xf32> to vector<8x32xf32>
    %206 = vector.extract_strided_slice %203 {offsets = [0, 64], sizes = [8, 32], strides = [1, 1]} : vector<8x128xf32> to vector<8x32xf32>
    %207 = vector.extract_strided_slice %203 {offsets = [0, 96], sizes = [8, 32], strides = [1, 1]} : vector<8x128xf32> to vector<8x32xf32>
    %208 = arith.mulf %205, %164 : vector<8x32xf32>
    %209 = arith.mulf %204, %206 : vector<8x32xf32>
    %210 = arith.addf %208, %209 : vector<8x32xf32>
    %211 = math.tanh %210 : vector<8x32xf32>
    %212 = arith.mulf %207, %211 : vector<8x32xf32>
    %213 = tpu.concatenate %74, %120, %166, %212 in 0 : vector<8x32xf32>, vector<8x32xf32>, vector<8x32xf32>, vector<8x32xf32> -> vector<32x32xf32>
    %cst_52 = arith.constant dense<0.000000e+00> : vector<32x128xf32>
    %214 = tpu.matmul %213, %3, %cst_52 {dimension_numbers = #tpu.dot_dimension_numbers<[1], [0], [0], [1], [0, 0, 1, 1], [], []>} : vector<32x32xf32>, vector<32x128xf32>, vector<32x128xf32> -> vector<32x128xf32>
    %215 = vector.broadcast %8 : vector<1x128xf32> to vector<32x128xf32>
    %216 = arith.addf %214, %215 : vector<32x128xf32>
    %c0_53 = arith.constant 0 : index
    %c0_54 = arith.constant 0 : index
    %217 = vector.load %arg5[%c0_53, %c0_54] : memref<32x128xf32, #tpu.memory_space<vmem>>, vector<32x128xf32>
    tpu.vector_store %arg5[%c0_53, %c0_54], %216 {strides = array<i32>} : memref<32x128xf32, #tpu.memory_space<vmem>>, vector<32x128xf32>,
    %218 = tpu.concatenate %212, %210 in 0 : vector<8x32xf32>, vector<8x32xf32> -> vector<16x32xf32>
    %c0_55 = arith.constant 0 : index
    %c0_56 = arith.constant 0 : index
    %219 = vector.load %arg6[%c0_55, %c0_56] : memref<16x32xf32, #tpu.memory_space<vmem>>, vector<16x32xf32>
    tpu.vector_store %arg6[%c0_55, %c0_56], %218 {strides = array<i32>} : memref<16x32xf32, #tpu.memory_space<vmem>>, vector<16x32xf32>,
    return
  }
}

</mosaic_0001>

<bundles_post_ra>
// kernel: social_model_forward.1
= control target key start
LH: loop header
LB: loop body
LE: loop exit
PB: predicated region body
PF: predicated region fallthrough
CT: control target
= control target key end

     0   :  { %vm64_vm0 = vcmask 1041408   ;;  %vm51_vm1 = vcmask 15360   ;;  %v2410_v17 = vmov 0.0   ;;  %vm263_vm2 = vcmask 261120   ;;  %s2413_s30 = smov 112   ;;  %s2414_s7 = smov 64   ;;  %s2869_s4 = inlined_call_operand.vmem [shape: f32[136,384], index: 4, kind: input, shape index: {}]   ;;  %s2870_s0 = inlined_call_operand.vmem [shape: f32[32,2], index: 0, kind: input, shape index: {}]   ;;  %s2871_s2 = inlined_call_operand.vmem [shape: f32[8,32], index: 2, kind: input, shape index: {}]   ;;  %s2872_s1 = inlined_call_operand.vmem [shape: f32[4,8,128], index: 1, kind: input, shape index: {}]   ;;  %s2873_s3 = inlined_call_operand.vmem [shape: f32[8,32], index: 3, kind: input, shape index: {}]   ;;  %s2874_s5 = inlined_call_operand.vmem [shape: f32[32,128], index: 5, kind: output, shape index: {0}]   ;;  %s2875_s6 = inlined_call_operand.vmem [shape: f32[16,32], index: 6, kind: output, shape index: {1}]  }
   0x1   :  { %v42_v0 = vld [vmem:[%s2869_s4 + $0x120] sm:$0x3]  ;;  %v48_v2 = vld [vmem:[%s2870_s0 + $0x8] sm:$0xff]  ;;  %v25_v7 = vld [vmem:[%s2869_s4 + $0x18] sm:$0xff]  ;;  %v2411_v23 = vmov 0.0|0.0   ;;  %vm157_vm3 = vcmask 130048  }
   0x2   :  { %v47_v1 = vld [vmem:[%s2870_s0] sm:$0xff]  ;;  %1963 = vmatprep.subr.msk.mxu0 %vm64_vm0, %v42_v0  ;;  %v23_v3 = vld [vmem:[%s2869_s4 + $0x8] sm:$0xff]  ;;  %v49_v8 = vld [vmem:[%s2870_s0 + $0x10] sm:$0xff]  ;;  %s2415_s8 = smov 96   ;;  %s2416_s9 = smov 32   ;;  %vm2419_vm4 = vmmov 0  }
   0x3   :  { %1965 = vmatprep.mubr.msk.f32.mxu0 %vm51_vm1, %v47_v1  ;;  %v26_v4 = vld [vmem:[%s2869_s4 + $0x20] sm:$0xff]  ;;  %1964 = vmatpush3.msk.msra.mxu0 %vm64_vm0, %v42_v0  ;;  %v29_v10 = vld [vmem:[%s2869_s4 + $0x38] sm:$0xff]  ;;  %v32_v11 = vld [vmem:[%s2869_s4 + $0x50] sm:$0xff]  ;;  %s2417_s10 = smov 48   ;;  %s2418_s11 = smov 16  }
   0x4   :  { %v22_v5 = vld [vmem:[%s2869_s4] sm:$0xff]  ;;  %v2475_v6 = vpack.c.bf16 %v26_v4, %v23_v3  ;;  %1966 = vmatmul.mubr.msk.f32.vlgmr.msra.gmra.mrb[0].mxu0 %vm51_vm1, %v48_v2  ;;  %v28_v12 = vld [vmem:[%s2869_s4 + $0x30] sm:$0xff]  ;;  %v50_v13 = vld [vmem:[%s2870_s0 + $0x18] sm:$0xff]  ;;  %v2500_v14 = vpack.c.bf16 %v32_v11, %v29_v10 }
   0x5   :  { %v2484_v9 = vpack.c.bf16 %v25_v7, %v22_v5  ;;  %1968 = vmatprep.mubr.msk.f32.mxu0 %vm51_vm1, %v49_v8  ;;  %v31_v15 = vld [vmem:[%s2869_s4 + $0x48] sm:$0xff]  ;;  %v2515_v18 = vld [vmem:[%s2871_s2] sm:$0xff]  ;;  %v35_v20 = vld [vmem:[%s2869_s4 + $0x78] sm:$0xff]  ;;  %s2412_s2 = smov 80  }
   0x6   :  { %2212 = vmatprep.subr.bf16.mxu0 %v2475_v6  ;;  %v2506_v16 = vpack.c.bf16 %v31_v15, %v28_v12  ;;  %v34_v19 = vld [vmem:[%s2869_s4 + $0x60] sm:$0xff]  ;;  %v43_v22 = vld [vmem:[%s2869_s4 + $0x138] ss:$0 sm:$0xff]  ;;  %v24_v38 = vld [vmem:[%s2869_s4 + $0x10] sm:$0xff] }
   0x7   :  { %2214 = vmatpush1.bf16.msra.mxu0 %v2484_v9  ;;  %v2207_v21 = vpack.c.bf16 %v35_v20, %v34_v19  ;;  %v27_v39 = vld [vmem:[%s2869_s4 + $0x28] sm:$0xff]  ;;  %v452_v63 = vld [vmem:[%s2872_s1] sm:$0xff]  ;;  %v36_v10 = vld [vmem:[%s2869_s4 + $0x90] sm:$0xff] }
   0x8   :  { %2216 = vmatprep.subr.bf16.mxu0 %v2500_v14  ;;  %1969 = vmatmul.mubr.msk.f32.gmra.mrb[2].mxu0 %vm51_vm1, %v50_v13  ;;  %v2558_v40 = vpack.c.bf16 %v27_v39, %v24_v38  ;;  %v45_v0 = vld [vmem:[%s2869_s4 + $0x168] ss:$0 sm:$0xff]  ;;  %v30_v13 = vld [vmem:[%s2869_s4 + $0x40] sm:$0xff]  ;;  %v33_v15 = vld [vmem:[%s2869_s4 + $0x58] sm:$0xff] }
   0x9   :  { %331 = vmatprep.mubr.f32.mxu0 %v2410_v17  ;;  %2208 = vmatprep.subr.bf16.mxu1 %v2207_v21  ;;  %v37_v11 = vld [vmem:[%s2869_s4 + $0xa8] sm:$0xff]  ;;  %v2598_v19 = vpack.c.bf16 %v33_v15, %v30_v13  ;;  %v256_v20 = vld [vmem:[%s2873_s3] sm:$0xff] }
   0xa   :  { %2210 = vmatpush3.bf16.msra.mxu1 %v2207_v21  ;;  %v2590_v12 = vpack.c.bf16 %v37_v11, %v36_v10 }
   0xb   :  { %2218 = vmatpush1.bf16.msra.mxu0 %v2506_v16  ;;  %2219 = vmatprep.subr.bf16.mxu1 %v2411_v23 }
   0xc   :  { %2225 = vmatprep.subr.bf16.mxu0 %v2411_v23 }
   0xe   :  { %1825 = vmatmul.mubr.msk.f32.vlgmr.msra.gmra.mrb[4].mxu0 %vm263_vm2, %v2515_v18 }
   0xf   :  { %2024 = vmatprep.mubr.msk.f32.mxu0 %vm2419_vm4, %v2410_v17 }
  0xd7   :  { %v1967_v24 = vpop.f32.mrb[0].mxu0 }
  0xd8   :  { %v140_v25 = vadd.f32 %v1967_v24, %v43_v22  ;;  %v134_v26 = vpop.f32.mrb[1].mxu0 }
  0xd9   :  { %v135_v27 = vadd.f32 %v134_v26, %v43_v22 }
  0xda   :  { %v154_v30 = vmax.f32 %v140_v25, 0.0 }
  0xdb   :  { %v153_v28 = vmax.f32 %v135_v27, 0.0  ;;  %v1970_v29 = vpop.f32.mrb[2].mxu0 }
  0xdc   :  { %v144_v31 = vpop.f32.mrb[3].mxu0  ;;  %v150_v32 = vadd.f32 %v1970_v29, %v43_v22 }
  0xdd   :  { %v145_v33 = vadd.f32 %v144_v31, %v43_v22  ;;  %1975 = vmatprep.mubr.msk.f32.mxu1 %vm157_vm3, %v153_v28  ;;  %v257_v28 = vlaneseq }
  0xde   :  { %1976 = vmatmul.mubr.msk.f32.vlgmr.msra.gmra.mrb[0].mxu1 %vm157_vm3, %v154_v30  ;;  %v156_v36 = vmax.f32 %v150_v32, 0.0 }
  0xdf   :  { %v155_v34 = vmax.f32 %v145_v33, 0.0  ;;  %2221 = vmatpush3.bf16.msra.mxu1 %v2558_v40  ;;  %v258_v29 = vand.u32 127, %v257_v28  ;;  %v1830_v28 = vld [vmem:[%s2872_s1 + $0x8] sm:$0xff] }
  0xe0   :  { %2222 = vmatprep.subr.bf16.mxu1 %v2411_v23 }
  0xe1   :  { %v333_v35 = vpop.f32.mrb[4].mxu0  ;;  %1978 = vmatprep.mubr.msk.f32.mxu1 %vm157_vm3, %v155_v34  ;;  %vm259_vm5 = vcmp.ge.s32.totalorder %v258_v29, 64  ;;  %vm260_vm6 = vcmp.lt.s32.totalorder %v258_v29, 96 }
  0xe2   :  { %415 = vrot.lane.b32.xlu1 %v333_v35, %s2412_s2  ;;  %409 = vrot.lane.b32.xlu0 %v333_v35, %s2413_s30  ;;  %v335_v37 = vpop.f32.mrb[5].mxu0  ;;  %vm2626_vm7 = vmand %vm259_vm5, %vm260_vm6 }
  0xe3   :  { %1979 = vmatmul.mubr.msk.f32.gmra.mrb[2].mxu1 %vm157_vm3, %v156_v36 }
  0xe4   :  { %1989 = vmatprep.mubr.msk.f32.mxu1 %vm2419_vm4, %v2410_v17  ;;  %2224 = vmatpush3.bf16.msra.mxu1 %v2598_v19 }
  0xe5   :  { %2253 = vmatprep.subr.bf16.mxu1 %v2475_v6 }
  0xe6   :  { %418 = vrot.lane.b32.xlu1 %v333_v35, %s2414_s7  ;;  %412 = vrot.lane.b32.xlu0 %v333_v35, %s2415_s8 }
  0xe7   :  { %1990 = vmatmul.mubr.msk.f32.vlgmr.msra.gmra.mrb[4].mxu1 %vm263_vm2, %v2515_v18  ;;  %v2618_v18 = vld [vmem:[%s2869_s4 + $0x150] ss:$0 sm:$0xff] }
  0xe8   :  { %2255 = vmatpush1.bf16.msra.mxu1 %v2484_v9  ;;  %694 = vmatprep.mubr.f32.mxu1 %v2410_v17 }
  0xe9   :  { %2257 = vmatprep.subr.bf16.mxu1 %v2500_v14 }
  0xea   :  { %424 = vrot.lane.b32.xlu1 %v333_v35, %s2416_s9  ;;  %421 = vrot.lane.b32.xlu0 %v333_v35, %s2417_s10 }
  0xec   :  { %2259 = vmatpush1.bf16.msra.mxu1 %v2506_v16 }
  0xed   :  { %2260 = vmatprep.subr.bf16.mxu1 %v2411_v23 }
  0xee   :  { %427 = vrot.lane.b32.xlu0 %v333_v35, %s2418_s11  ;;  %431 = vrot.lane.b32.xlu1 %v335_v37, %s2413_s30 }
  0xf2   :  { %434 = vrot.lane.b32.xlu0 %v335_v37, %s2415_s8  ;;  %437 = vrot.lane.b32.xlu1 %v335_v37, %s2412_s2 }
  0xf6   :  { %440 = vrot.lane.b32.xlu0 %v335_v37, %s2414_s7  ;;  %443 = vrot.lane.b32.xlu1 %v335_v37, %s2417_s10 }
  0xfa   :  { %446 = vrot.lane.b32.xlu0 %v335_v37, %s2416_s9  ;;  %449 = vrot.lane.b32.xlu1 %v335_v37, %s2418_s11 }
  0xfe   :  { %605 = vrot.lane.b32.xlu1 %v256_v20, %s2416_s9 }
 0x154   :  { %v416_v41 = vpop.permute.xlu1 %415  ;;  %v410_v42 = vpop.permute.xlu0 %409 }
 0x155   :  { %v2226_v43 = vpack.c.bf16 %v410_v42, %v333_v35  ;;  %v2420_v35 = vmov 0.5  }
 0x156   :  { %v2632_v36 = vsel %vm2626_vm7, 1.0, %v2420_v35 }
 0x157   :  { %2227 = vmatpush3.bf16.msra.mxu0 %v2226_v43 }
 0x158   :  { %v419_v44 = vpop.permute.xlu1 %418  ;;  %v413_v45 = vpop.permute.xlu0 %412  ;;  %2228 = vmatprep.subr.bf16.mxu0 %v2411_v23 }
 0x159   :  { %v2229_v46 = vpack.c.bf16 %v416_v41, %v413_v45 }
 0x15b   :  { %2230 = vmatpush3.bf16.msra.mxu0 %v2229_v46 }
 0x15c   :  { %v425_v47 = vpop.permute.xlu1 %424  ;;  %v422_v48 = vpop.permute.xlu0 %421  ;;  %2231 = vmatprep.subr.bf16.mxu0 %v2411_v23 }
 0x15d   :  { %v2232_v49 = vpack.c.bf16 %v422_v48, %v419_v44 }
 0x15f   :  { %2233 = vmatpush3.bf16.msra.mxu0 %v2232_v49 }
 0x160   :  { %v428_v50 = vpop.permute.xlu0 %427  ;;  %v432_v51 = vpop.permute.xlu1 %431  ;;  %2234 = vmatprep.subr.bf16.mxu0 %v2411_v23 }
 0x161   :  { %v2235_v52 = vpack.c.bf16 %v428_v50, %v425_v47  ;;  %v2238_v55 = vpack.c.bf16 %v432_v51, %v335_v37 }
 0x163   :  { %2236 = vmatpush3.bf16.msra.mxu0 %v2235_v52 }
 0x164   :  { %v435_v53 = vpop.permute.xlu0 %434  ;;  %v438_v54 = vpop.permute.xlu1 %437  ;;  %2237 = vmatprep.subr.bf16.mxu0 %v2411_v23 }
 0x165   :  { %v2241_v58 = vpack.c.bf16 %v438_v54, %v435_v53 }
 0x167   :  { %2239 = vmatpush3.bf16.msra.mxu0 %v2238_v55 }
 0x168   :  { %v441_v56 = vpop.permute.xlu0 %440  ;;  %v444_v57 = vpop.permute.xlu1 %443  ;;  %2240 = vmatprep.subr.bf16.mxu0 %v2411_v23 }
 0x169   :  { %v2244_v59 = vpack.c.bf16 %v444_v57, %v441_v56 }
 0x16b   :  { %2242 = vmatpush3.bf16.msra.mxu0 %v2241_v58 }
 0x16c   :  { %2243 = vmatprep.subr.bf16.mxu0 %v2411_v23  ;;  %v447_v60 = vpop.permute.xlu0 %446  ;;  %v450_v61 = vpop.permute.xlu1 %449 }
 0x16d   :  { %v2247_v62 = vpack.c.bf16 %v450_v61, %v447_v60 }
 0x16f   :  { %2245 = vmatpush3.bf16.msra.mxu0 %v2244_v59 }
 0x170   :  { %2246 = vmatprep.subr.bf16.mxu0 %v2411_v23  ;;  %v606_v46 = vpop.permute.xlu1 %605 }
 0x173   :  { %2248 = vmatpush3.bf16.msra.mxu0 %v2247_v62 }
 0x174   :  { %2249 = vmatprep.subr.bf16.mxu0 %v2411_v23 }
 0x176   :  { %2025 = vmatmul.mubr.f32.vlgmr.msra.gmra.mrb[6].mxu0 %v452_v63 }
 0x177   :  { %2031 = vmatprep.mubr.msk.f32.mxu0 %vm2419_vm4, %v2410_v17  ;;  %2251 = vmatpush3.bf16.msra.mxu0 %v2590_v12 }
 0x178   :  { %2290 = vmatprep.subr.bf16.mxu0 %v2411_v23 }
 0x1b1   :  { %v1977_v1 = vpop.f32.mrb[0].mxu1 }
 0x1b2   :  { %v2578_v2 = vadd.f32 %v1977_v1, %v45_v0  ;;  %v236_v3 = vpop.f32.mrb[1].mxu1 }
 0x1b3   :  { %v237_v30 = vadd.f32 %v236_v3, %v45_v0 }
 0x1b6   :  { %v1980_v4 = vpop.f32.mrb[2].mxu1 }
 0x1b7   :  { %v2580_v5 = vadd.f32 %v1980_v4, %v45_v0  ;;  %v246_v7 = vpop.f32.mrb[3].mxu1 }
 0x1b8   :  { %v2582_v8 = vadd.f32 %v246_v7, %v45_v0 }
 0x1ba   :  { %v404_v26 = vpop.f32.mrb[4].mxu1 }
 0x1bb   :  { %v1991_v27 = vpop.f32.mrb[5].mxu1 }
 0x249   :  { %v519_v21 = vpop.f32.mrb[6].mxu0 }
 0x24a   :  { %v520_v22 = vadd.f32 %v519_v21, %v2618_v18  ;;  %v2026_v24 = vpop.f32.mrb[7].mxu0 }
 0x24c   :  { %v523_v25 = vmax.f32 %v520_v22, 0.0 }
 0x24e   :  { %2032 = vmatmul.mubr.msk.f32.vlgmr.msra.gmra.mrb[8].mxu0 %vm157_vm3, %v523_v25 }
 0x24f   :  { %2292 = vmatpush3.bf16.msra.mxu0 %v2590_v12  ;;  %2084 = vmatprep.mubr.msk.f32.mxu0 %vm2419_vm4, %v2410_v17 }
 0x250   :  { %2294 = vmatprep.subr.bf16.mxu0 %v2475_v6 }
 0x321   :  { %v593_v32 = vpop.f32.mrb[8].mxu0 }
 0x322   :  { %v597_v33 = vadd.f32 %v593_v32, %v237_v30  ;;  %v2033_v34 = vpop.f32.mrb[9].mxu0 }
 0x324   :  { %v598_v37 = vadd.f32 %v597_v33, %v404_v26 }
 0x326   :  { %v599_v38 = vmul.f32 %v598_v37, %v2632_v36 }
 0x328   :  { %2394 = vtanh.f32 %v599_v38 }
 0x332   :  { %v2395_v39 = vpop.eup %2394 }
 0x333   :  { %v601_v41 = vmul.f32 0.5, %v2395_v39 }
 0x335   :  { %v602_v42 = vadd.f32 0.5, %v601_v41 }
 0x337   :  { %v603_v43 = vsel %vm2626_vm7, %v2395_v39, %v602_v42 }
 0x338   :  { %610 = vrot.lane.b32.xlu0 %v603_v43, %s2414_s7  ;;  %v608_v47 = vmul.f32 %v606_v46, %v603_v43 }
 0x3aa   :  { %v611_v44 = vpop.permute.xlu0 %610 }
 0x3ab   :  { %v613_v45 = vmul.f32 %v611_v44, %v603_v43 }
 0x3ad   :  { %615 = vrot.lane.b32.xlu0 %v613_v45, %s2416_s9 }
 0x41f   :  { %v616_v48 = vpop.permute.xlu0 %615 }
 0x420   :  { %v2639_v49 = vadd.f32 %v616_v48, %v608_v47 }
 0x422   :  { %2396 = vtanh.f32 %v2639_v49 }
 0x42c   :  { %v2397_v50 = vpop.eup %2396 }
 0x42d   :  { %621 = vrot.lane.b32.xlu1 %v2397_v50, %s2414_s7 }
 0x49f   :  { %v622_v51 = vpop.permute.xlu1 %621 }
 0x4a0   :  { %v624_v52 = vmul.f32 %v622_v51, %v603_v43 }
 0x4a2   :  { %626 = vrot.lane.b32.xlu0 %v624_v52, %s2416_s9 }
 0x514   :  { %v2644_v53 = vpop.permute.xlu0 %626 }
 0x515   :  { %1828 = vmatmul.mubr.msk.f32.vlgmr.msra.gmra.mrb[6].mxu1 %vm263_vm2, %v2644_v53 }
 0x516   :  { %2262 = vmatpush3.bf16.msra.mxu1 %v2558_v40  ;;  %2042 = vmatprep.mubr.msk.f32.mxu1 %vm2419_vm4, %v2410_v17 }
 0x517   :  { %2263 = vmatprep.subr.bf16.mxu1 %v2411_v23 }
 0x51a   :  { %2265 = vmatpush3.bf16.msra.mxu1 %v2598_v19 }
 0x51b   :  { %2266 = vmatprep.subr.bf16.mxu1 %v2411_v23 }
 0x51d   :  { %2043 = vmatmul.mubr.msk.f32.vlgmr.msra.gmra.mrb[8].mxu1 %vm263_vm2, %v2644_v53 }
 0x51e   :  { %2077 = vmatprep.mubr.msk.f32.mxu1 %vm2419_vm4, %v2410_v17 }
 0x5e8   :  { %v696_v54 = vpop.f32.mrb[6].mxu1 }
 0x5e9   :  { %775 = vrot.lane.b32.xlu0 %v696_v54, %s2415_s8  ;;  %772 = vrot.lane.b32.xlu1 %v696_v54, %s2413_s30  ;;  %v698_v55 = vpop.f32.mrb[7].mxu1 }
 0x5ed   :  { %781 = vrot.lane.b32.xlu0 %v696_v54, %s2414_s7  ;;  %778 = vrot.lane.b32.xlu1 %v696_v54, %s2412_s2 }
 0x5f0   :  { %v2662_v56 = vpop.f32.mrb[8].mxu1 }
 0x5f1   :  { %v2044_v57 = vpop.f32.mrb[9].mxu1  ;;  %787 = vrot.lane.b32.xlu0 %v696_v54, %s2416_s9  ;;  %784 = vrot.lane.b32.xlu1 %v696_v54, %s2417_s10 }
 0x5f5   :  { %790 = vrot.lane.b32.xlu1 %v696_v54, %s2418_s11  ;;  %794 = vrot.lane.b32.xlu0 %v698_v55, %s2413_s30 }
 0x5f9   :  { %797 = vrot.lane.b32.xlu1 %v698_v55, %s2415_s8  ;;  %800 = vrot.lane.b32.xlu0 %v698_v55, %s2412_s2 }
 0x5fd   :  { %803 = vrot.lane.b32.xlu1 %v698_v55, %s2414_s7  ;;  %806 = vrot.lane.b32.xlu0 %v698_v55, %s2417_s10 }
 0x601   :  { %809 = vrot.lane.b32.xlu1 %v698_v55, %s2416_s9  ;;  %812 = vrot.lane.b32.xlu0 %v698_v55, %s2418_s11 }
 0x65b   :  { %v776_v58 = vpop.permute.xlu0 %775  ;;  %v773_v59 = vpop.permute.xlu1 %772 }
 0x65c   :  { %v2267_v60 = vpack.c.bf16 %v773_v59, %v696_v54 }
 0x65e   :  { %2268 = vmatpush3.bf16.msra.mxu1 %v2267_v60 }
 0x65f   :  { %v782_v61 = vpop.permute.xlu0 %781  ;;  %v779_v62 = vpop.permute.xlu1 %778  ;;  %2269 = vmatprep.subr.bf16.mxu1 %v2411_v23 }
 0x660   :  { %v2270_v63 = vpack.c.bf16 %v779_v62, %v776_v58 }
 0x662   :  { %2271 = vmatpush3.bf16.msra.mxu1 %v2270_v63 }
 0x663   :  { %v788_v0 = vpop.permute.xlu0 %787  ;;  %v785_v1 = vpop.permute.xlu1 %784  ;;  %2272 = vmatprep.subr.bf16.mxu1 %v2411_v23 }
 0x664   :  { %v2273_v3 = vpack.c.bf16 %v785_v1, %v782_v61 }
 0x666   :  { %2274 = vmatpush3.bf16.msra.mxu1 %v2273_v3 }
 0x667   :  { %v791_v4 = vpop.permute.xlu1 %790  ;;  %v795_v7 = vpop.permute.xlu0 %794  ;;  %2275 = vmatprep.subr.bf16.mxu1 %v2411_v23 }
 0x668   :  { %v2276_v10 = vpack.c.bf16 %v791_v4, %v788_v0  ;;  %v2279_v15 = vpack.c.bf16 %v795_v7, %v698_v55 }
 0x66a   :  { %2277 = vmatpush3.bf16.msra.mxu1 %v2276_v10 }
 0x66b   :  { %v798_v11 = vpop.permute.xlu1 %797  ;;  %v801_v13 = vpop.permute.xlu0 %800  ;;  %2278 = vmatprep.subr.bf16.mxu1 %v2411_v23 }
 0x66c   :  { %v2282_v22 = vpack.c.bf16 %v801_v13, %v798_v11 }
 0x66e   :  { %2280 = vmatpush3.bf16.msra.mxu1 %v2279_v15 }
 0x66f   :  { %v804_v20 = vpop.permute.xlu1 %803  ;;  %v807_v21 = vpop.permute.xlu0 %806  ;;  %2281 = vmatprep.subr.bf16.mxu1 %v2411_v23 }
 0x670   :  { %v2285_v24 = vpack.c.bf16 %v807_v21, %v804_v20 }
 0x672   :  { %2283 = vmatpush3.bf16.msra.mxu1 %v2282_v22 }
 0x673   :  { %2284 = vmatprep.subr.bf16.mxu1 %v2411_v23  ;;  %v810_v25 = vpop.permute.xlu1 %809  ;;  %v813_v26 = vpop.permute.xlu0 %812 }
 0x674   :  { %v2288_v27 = vpack.c.bf16 %v813_v26, %v810_v25 }
 0x676   :  { %2286 = vmatpush3.bf16.msra.mxu1 %v2285_v24 }
 0x677   :  { %2287 = vmatprep.subr.bf16.mxu1 %v2411_v23 }
 0x67a   :  { %2289 = vmatpush3.bf16.msra.mxu1 %v2288_v27  ;;  %v1834_v27 = vld [vmem:[%s2872_s1 + $0x10] sm:$0xff] }
 0x67b   :  { %2331 = vmatprep.subr.bf16.mxu1 %v2411_v23 }
 0x67d   :  { %2078 = vmatmul.mubr.f32.vlgmr.msra.gmra.mrb[10].mxu1 %v1830_v28 }
 0x67e   :  { %2333 = vmatpush3.bf16.msra.mxu1 %v2590_v12  ;;  %2137 = vmatprep.mubr.msk.f32.mxu1 %vm2419_vm4, %v2410_v17 }
 0x67f   :  { %2335 = vmatprep.subr.bf16.mxu1 %v2475_v6 }
 0x750   :  { %v883_v29 = vpop.f32.mrb[10].mxu1 }
 0x751   :  { %v884_v30 = vadd.f32 %v883_v29, %v2618_v18  ;;  %v2079_v32 = vpop.f32.mrb[11].mxu1 }
 0x753   :  { %v887_v33 = vmax.f32 %v884_v30, 0.0 }
 0x755   :  { %2085 = vmatmul.mubr.msk.f32.vlgmr.msra.gmra.mrb[10].mxu0 %vm157_vm3, %v887_v33 }
 0x756   :  { %2296 = vmatpush1.bf16.msra.mxu0 %v2484_v9  ;;  %1054 = vmatprep.mubr.f32.mxu0 %v2410_v17 }
 0x757   :  { %2298 = vmatprep.subr.bf16.mxu0 %v2500_v14 }
 0x75a   :  { %2300 = vmatpush1.bf16.msra.mxu0 %v2506_v16 }
 0x75b   :  { %2301 = vmatprep.subr.bf16.mxu0 %v2411_v23 }
 0x828   :  { %v957_v34 = vpop.f32.mrb[10].mxu0 }
 0x829   :  { %v961_v6 = vadd.f32 %v957_v34, %v2578_v2  ;;  %v2086_v35 = vpop.f32.mrb[11].mxu0 }
 0x82b   :  { %v962_v37 = vadd.f32 %v961_v6, %v2662_v56 }
 0x82d   :  { %v963_v38 = vmul.f32 %v962_v37, %v2632_v36 }
 0x82f   :  { %2398 = vtanh.f32 %v963_v38 }
 0x839   :  { %v2399_v39 = vpop.eup %2398 }
 0x83a   :  { %v965_v41 = vmul.f32 0.5, %v2399_v39 }
 0x83c   :  { %v966_v42 = vadd.f32 0.5, %v965_v41 }
 0x83e   :  { %v967_v43 = vsel %vm2626_vm7, %v2399_v39, %v966_v42 }
 0x83f   :  { %970 = vrot.lane.b32.xlu1 %v967_v43, %s2414_s7  ;;  %v968_v2 = vmul.f32 %v967_v43, %v2639_v49 }
 0x8b1   :  { %v971_v44 = vpop.permute.xlu1 %970 }
 0x8b2   :  { %v973_v45 = vmul.f32 %v971_v44, %v967_v43 }
 0x8b4   :  { %975 = vrot.lane.b32.xlu0 %v973_v45, %s2416_s9 }
 0x926   :  { %v976_v46 = vpop.permute.xlu0 %975 }
 0x927   :  { %v2704_v47 = vadd.f32 %v976_v46, %v968_v2 }
 0x929   :  { %2400 = vtanh.f32 %v2704_v47 }
 0x933   :  { %v2401_v48 = vpop.eup %2400 }
 0x934   :  { %981 = vrot.lane.b32.xlu1 %v2401_v48, %s2414_s7 }
 0x9a6   :  { %v982_v50 = vpop.permute.xlu1 %981 }
 0x9a7   :  { %v984_v51 = vmul.f32 %v982_v50, %v967_v43 }
 0x9a9   :  { %986 = vrot.lane.b32.xlu0 %v984_v51, %s2416_s9 }
 0xa1b   :  { %v2709_v52 = vpop.permute.xlu0 %986 }
 0xa1c   :  { %1832 = vmatmul.mubr.msk.f32.vlgmr.msra.gmra.mrb[12].mxu0 %vm263_vm2, %v2709_v52 }
 0xa1d   :  { %2303 = vmatpush3.bf16.msra.mxu0 %v2558_v40  ;;  %2095 = vmatprep.mubr.msk.f32.mxu0 %vm2419_vm4, %v2410_v17 }
 0xa1e   :  { %2304 = vmatprep.subr.bf16.mxu0 %v2411_v23 }
 0xa21   :  { %2306 = vmatpush3.bf16.msra.mxu0 %v2598_v19 }
 0xa22   :  { %2307 = vmatprep.subr.bf16.mxu0 %v2411_v23 }
 0xa24   :  { %2096 = vmatmul.mubr.msk.f32.vlgmr.msra.gmra.mrb[14].mxu0 %vm263_vm2, %v2709_v52 }
 0xa25   :  { %2130 = vmatprep.mubr.msk.f32.mxu0 %vm2419_vm4, %v2410_v17 }
 0xaef   :  { %v1056_v49 = vpop.f32.mrb[12].mxu0 }
 0xaf0   :  { %1135 = vrot.lane.b32.xlu0 %v1056_v49, %s2415_s8  ;;  %1132 = vrot.lane.b32.xlu1 %v1056_v49, %s2413_s30  ;;  %v1058_v54 = vpop.f32.mrb[13].mxu0 }
 0xaf4   :  { %1141 = vrot.lane.b32.xlu0 %v1056_v49, %s2414_s7  ;;  %1138 = vrot.lane.b32.xlu1 %v1056_v49, %s2412_s2 }
 0xaf7   :  { %v2727_v55 = vpop.f32.mrb[14].mxu0 }
 0xaf8   :  { %v2097_v56 = vpop.f32.mrb[15].mxu0  ;;  %1147 = vrot.lane.b32.xlu0 %v1056_v49, %s2416_s9  ;;  %1144 = vrot.lane.b32.xlu1 %v1056_v49, %s2417_s10 }
 0xafc   :  { %1150 = vrot.lane.b32.xlu1 %v1056_v49, %s2418_s11  ;;  %1154 = vrot.lane.b32.xlu0 %v1058_v54, %s2413_s30 }
 0xb00   :  { %1157 = vrot.lane.b32.xlu1 %v1058_v54, %s2415_s8  ;;  %1160 = vrot.lane.b32.xlu0 %v1058_v54, %s2412_s2 }
 0xb04   :  { %1163 = vrot.lane.b32.xlu1 %v1058_v54, %s2414_s7  ;;  %1166 = vrot.lane.b32.xlu0 %v1058_v54, %s2417_s10 }
 0xb08   :  { %1169 = vrot.lane.b32.xlu1 %v1058_v54, %s2416_s9  ;;  %1172 = vrot.lane.b32.xlu0 %v1058_v54, %s2418_s11 }
 0xb62   :  { %v1136_v57 = vpop.permute.xlu0 %1135  ;;  %v1133_v58 = vpop.permute.xlu1 %1132 }
 0xb63   :  { %v2308_v59 = vpack.c.bf16 %v1133_v58, %v1056_v49 }
 0xb65   :  { %2309 = vmatpush3.bf16.msra.mxu0 %v2308_v59 }
 0xb66   :  { %v1142_v60 = vpop.permute.xlu0 %1141  ;;  %v1139_v61 = vpop.permute.xlu1 %1138  ;;  %2310 = vmatprep.subr.bf16.mxu0 %v2411_v23 }
 0xb67   :  { %v2311_v62 = vpack.c.bf16 %v1139_v61, %v1136_v57 }
 0xb69   :  { %2312 = vmatpush3.bf16.msra.mxu0 %v2311_v62 }
 0xb6a   :  { %v1148_v63 = vpop.permute.xlu0 %1147  ;;  %v1145_v0 = vpop.permute.xlu1 %1144  ;;  %2313 = vmatprep.subr.bf16.mxu0 %v2411_v23 }
 0xb6b   :  { %v2314_v1 = vpack.c.bf16 %v1145_v0, %v1142_v60 }
 0xb6d   :  { %2315 = vmatpush3.bf16.msra.mxu0 %v2314_v1 }
 0xb6e   :  { %v1151_v3 = vpop.permute.xlu1 %1150  ;;  %v1155_v4 = vpop.permute.xlu0 %1154  ;;  %2316 = vmatprep.subr.bf16.mxu0 %v2411_v23 }
 0xb6f   :  { %v2317_v7 = vpack.c.bf16 %v1151_v3, %v1148_v63  ;;  %v2320_v13 = vpack.c.bf16 %v1155_v4, %v1058_v54 }
 0xb71   :  { %2318 = vmatpush3.bf16.msra.mxu0 %v2317_v7 }
 0xb72   :  { %v1158_v10 = vpop.permute.xlu1 %1157  ;;  %v1161_v11 = vpop.permute.xlu0 %1160  ;;  %2319 = vmatprep.subr.bf16.mxu0 %v2411_v23 }
 0xb73   :  { %v2323_v21 = vpack.c.bf16 %v1161_v11, %v1158_v10 }
 0xb75   :  { %2321 = vmatpush3.bf16.msra.mxu0 %v2320_v13  ;;  %v1838_v13 = vld [vmem:[%s2872_s1 + $0x18] sm:$0xff] }
 0xb76   :  { %v1164_v15 = vpop.permute.xlu1 %1163  ;;  %v1167_v20 = vpop.permute.xlu0 %1166  ;;  %2322 = vmatprep.subr.bf16.mxu0 %v2411_v23 }
 0xb77   :  { %v2326_v22 = vpack.c.bf16 %v1167_v20, %v1164_v15  ;;  %v38_v15 = vld [vmem:[%s2869_s4 + $0xc0] sm:$0xff]  ;;  %v39_v20 = vld [vmem:[%s2869_s4 + $0xd8] sm:$0xff] }
 0xb79   :  { %2324 = vmatpush3.bf16.msra.mxu0 %v2323_v21  ;;  %v2375_v21 = vpack.c.bf16 %v39_v20, %v38_v15 }
 0xb7a   :  { %2325 = vmatprep.subr.bf16.mxu0 %v2411_v23  ;;  %v1170_v24 = vpop.permute.xlu1 %1169  ;;  %v1173_v25 = vpop.permute.xlu0 %1172 }
 0xb7b   :  { %v2329_v26 = vpack.c.bf16 %v1173_v25, %v1170_v24  ;;  %v41_v24 = vld [vmem:[%s2869_s4 + $0x108] sm:$0xff] }
 0xb7d   :  { %2327 = vmatpush3.bf16.msra.mxu0 %v2326_v22 }
 0xb7e   :  { %2328 = vmatprep.subr.bf16.mxu0 %v2411_v23 }
 0xb81   :  { %2330 = vmatpush3.bf16.msra.mxu0 %v2329_v26 }
 0xb82   :  { %2372 = vmatprep.subr.bf16.mxu0 %v2411_v23 }
 0xb84   :  { %2131 = vmatmul.mubr.f32.vlgmr.msra.gmra.mrb[16].mxu0 %v1834_v27 }
 0xb85   :  { %2374 = vmatpush3.bf16.msra.mxu0 %v2590_v12  ;;  %2190 = vmatprep.mubr.msk.f32.mxu0 %vm2419_vm4, %v2410_v17 }
 0xb86   :  { %2376 = vmatprep.subr.bf16.mxu0 %v2375_v21 }
 0xc57   :  { %v1243_v28 = vpop.f32.mrb[16].mxu0 }
 0xc58   :  { %v1244_v29 = vadd.f32 %v1243_v28, %v2618_v18  ;;  %v2132_v30 = vpop.f32.mrb[17].mxu0 }
 0xc5a   :  { %v1247_v32 = vmax.f32 %v1244_v29, 0.0 }
 0xc5c   :  { %2138 = vmatmul.mubr.msk.f32.vlgmr.msra.gmra.mrb[12].mxu1 %vm157_vm3, %v1247_v32 }
 0xc5d   :  { %2337 = vmatpush1.bf16.msra.mxu1 %v2484_v9  ;;  %1414 = vmatprep.mubr.f32.mxu1 %v2410_v17 }
 0xc5e   :  { %2339 = vmatprep.subr.bf16.mxu1 %v2500_v14 }
 0xc61   :  { %2341 = vmatpush1.bf16.msra.mxu1 %v2506_v16 }
 0xc62   :  { %2342 = vmatprep.subr.bf16.mxu1 %v2411_v23 }
 0xd2f   :  { %v1317_v12 = vpop.f32.mrb[12].mxu1 }
 0xd30   :  { %v1321_v33 = vadd.f32 %v1317_v12, %v2582_v8  ;;  %v2139_v34 = vpop.f32.mrb[13].mxu1 }
 0xd32   :  { %v1322_v6 = vadd.f32 %v1321_v33, %v2727_v55 }
 0xd34   :  { %v1323_v35 = vmul.f32 %v1322_v6, %v2632_v36 }
 0xd36   :  { %2402 = vtanh.f32 %v1323_v35 }
 0xd40   :  { %v2403_v37 = vpop.eup %2402 }
 0xd41   :  { %v1325_v38 = vmul.f32 0.5, %v2403_v37 }
 0xd43   :  { %v1326_v9 = vadd.f32 0.5, %v1325_v38 }
 0xd45   :  { %v1327_v39 = vsel %vm2626_vm7, %v2403_v37, %v1326_v9 }
 0xd46   :  { %1330 = vrot.lane.b32.xlu1 %v1327_v39, %s2414_s7  ;;  %v1328_v8 = vmul.f32 %v1327_v39, %v2704_v47 }
 0xdb8   :  { %v1331_v14 = vpop.permute.xlu1 %1330 }
 0xdb9   :  { %v1333_v16 = vmul.f32 %v1331_v14, %v1327_v39 }
 0xdbb   :  { %1335 = vrot.lane.b32.xlu0 %v1333_v16, %s2416_s9 }
 0xe2d   :  { %v1336_v41 = vpop.permute.xlu0 %1335 }
 0xe2e   :  { %v2768_v42 = vadd.f32 %v1336_v41, %v1328_v8 }
 0xe30   :  { %2404 = vtanh.f32 %v2768_v42 }
 0xe3a   :  { %v2405_v43 = vpop.eup %2404 }
 0xe3b   :  { %1341 = vrot.lane.b32.xlu1 %v2405_v43, %s2414_s7 }
 0xead   :  { %v1342_v44 = vpop.permute.xlu1 %1341 }
 0xeae   :  { %v1344_v45 = vmul.f32 %v1342_v44, %v1327_v39 }
 0xeb0   :  { %1346 = vrot.lane.b32.xlu0 %v1344_v45, %s2416_s9 }
 0xf22   :  { %v2773_v2 = vpop.permute.xlu0 %1346 }
 0xf23   :  { %1836 = vmatmul.mubr.msk.f32.vlgmr.msra.gmra.mrb[14].mxu1 %vm263_vm2, %v2773_v2 }
 0xf24   :  { %2344 = vmatpush3.bf16.msra.mxu1 %v2558_v40  ;;  %2148 = vmatprep.mubr.msk.f32.mxu1 %vm2419_vm4, %v2410_v17 }
 0xf25   :  { %2345 = vmatprep.subr.bf16.mxu1 %v2411_v23 }
 0xf28   :  { %2347 = vmatpush3.bf16.msra.mxu1 %v2598_v19 }
 0xf29   :  { %2348 = vmatprep.subr.bf16.mxu1 %v2411_v23 }
 0xf2b   :  { %2149 = vmatmul.mubr.msk.f32.vlgmr.msra.gmra.mrb[16].mxu1 %vm263_vm2, %v2773_v2 }
 0xf2c   :  { %2183 = vmatprep.mubr.msk.f32.mxu1 %vm2419_vm4, %v2410_v17 }
 0xff6   :  { %v1416_v46 = vpop.f32.mrb[14].mxu1 }
 0xff7   :  { %1495 = vrot.lane.b32.xlu0 %v1416_v46, %s2415_s8  ;;  %1492 = vrot.lane.b32.xlu1 %v1416_v46, %s2413_s30  ;;  %v1418_v40 = vpop.f32.mrb[15].mxu1 }
 0xffb   :  { %1501 = vrot.lane.b32.xlu0 %v1416_v46, %s2414_s7  ;;  %1498 = vrot.lane.b32.xlu1 %v1416_v46, %s2412_s2 }
 0xffe   :  { %v2791_v47 = vpop.f32.mrb[16].mxu1 }
 0xfff   :  { %v2150_v19 = vpop.f32.mrb[17].mxu1  ;;  %1507 = vrot.lane.b32.xlu0 %v1416_v46, %s2416_s9  ;;  %1504 = vrot.lane.b32.xlu1 %v1416_v46, %s2417_s10 }
0x1003   :  { %1510 = vrot.lane.b32.xlu1 %v1416_v46, %s2418_s11  ;;  %1514 = vrot.lane.b32.xlu0 %v1418_v40, %s2413_s30 }
0x1007   :  { %1517 = vrot.lane.b32.xlu1 %v1418_v40, %s2415_s8  ;;  %1520 = vrot.lane.b32.xlu0 %v1418_v40, %s2412_s2 }
0x100b   :  { %1523 = vrot.lane.b32.xlu1 %v1418_v40, %s2414_s7  ;;  %1526 = vrot.lane.b32.xlu0 %v1418_v40, %s2417_s10 }
0x100f   :  { %1529 = vrot.lane.b32.xlu1 %v1418_v40, %s2416_s9  ;;  %1532 = vrot.lane.b32.xlu0 %v1418_v40, %s2418_s11 }
0x1069   :  { %v1496_v17 = vpop.permute.xlu0 %1495  ;;  %v1493_v48 = vpop.permute.xlu1 %1492 }
0x106a   :  { %v2349_v50 = vpack.c.bf16 %v1493_v48, %v1416_v46 }
0x106c   :  { %2350 = vmatpush3.bf16.msra.mxu1 %v2349_v50 }
0x106d   :  { %v1502_v51 = vpop.permute.xlu0 %1501  ;;  %v1499_v49 = vpop.permute.xlu1 %1498  ;;  %2351 = vmatprep.subr.bf16.mxu1 %v2411_v23 }
0x106e   :  { %v2352_v54 = vpack.c.bf16 %v1499_v49, %v1496_v17 }
0x1070   :  { %2353 = vmatpush3.bf16.msra.mxu1 %v2352_v54 }
0x1071   :  { %v1508_v55 = vpop.permute.xlu0 %1507  ;;  %v1505_v56 = vpop.permute.xlu1 %1504  ;;  %2354 = vmatprep.subr.bf16.mxu1 %v2411_v23 }
0x1072   :  { %v2355_v57 = vpack.c.bf16 %v1505_v56, %v1502_v51 }
0x1074   :  { %2356 = vmatpush3.bf16.msra.mxu1 %v2355_v57 }
0x1075   :  { %v1511_v58 = vpop.permute.xlu1 %1510  ;;  %v1515_v59 = vpop.permute.xlu0 %1514  ;;  %2357 = vmatprep.subr.bf16.mxu1 %v2411_v23 }
0x1076   :  { %v2358_v60 = vpack.c.bf16 %v1511_v58, %v1508_v55  ;;  %v2361_v63 = vpack.c.bf16 %v1515_v59, %v1418_v40 }
0x1078   :  { %2359 = vmatpush3.bf16.msra.mxu1 %v2358_v60 }
0x1079   :  { %v1518_v61 = vpop.permute.xlu1 %1517  ;;  %v1521_v62 = vpop.permute.xlu0 %1520  ;;  %2360 = vmatprep.subr.bf16.mxu1 %v2411_v23 }
0x107a   :  { %v2364_v3 = vpack.c.bf16 %v1521_v62, %v1518_v61 }
0x107c   :  { %2362 = vmatpush3.bf16.msra.mxu1 %v2361_v63 }
0x107d   :  { %v1524_v0 = vpop.permute.xlu1 %1523  ;;  %v1527_v1 = vpop.permute.xlu0 %1526  ;;  %2363 = vmatprep.subr.bf16.mxu1 %v2411_v23 }
0x107e   :  { %v2367_v4 = vpack.c.bf16 %v1527_v1, %v1524_v0 }
0x1080   :  { %2365 = vmatpush3.bf16.msra.mxu1 %v2364_v3 }
0x1081   :  { %2366 = vmatprep.subr.bf16.mxu1 %v2411_v23  ;;  %v1530_v7 = vpop.permute.xlu1 %1529  ;;  %v1533_v10 = vpop.permute.xlu0 %1532 }
0x1082   :  { %v2370_v11 = vpack.c.bf16 %v1533_v10, %v1530_v7 }
0x1084   :  { %2368 = vmatpush3.bf16.msra.mxu1 %v2367_v4 }
0x1085   :  { %2369 = vmatprep.subr.bf16.mxu1 %v2411_v23  ;;  %v40_v23 = vld [vmem:[%s2869_s4 + $0xf0] sm:$0xff] }
0x1086   :  { %v2379_v28 = vpack.c.bf16 %v41_v24, %v40_v23 }
0x1088   :  { %2371 = vmatpush3.bf16.msra.mxu1 %v2370_v11 }
0x108b   :  { %2184 = vmatmul.mubr.f32.vlgmr.msra.gmra.mrb[18].mxu1 %v1838_v13 }
0x115e   :  { %v1603_v22 = vpop.f32.mrb[18].mxu1 }
0x115f   :  { %v1604_v25 = vadd.f32 %v1603_v22, %v2618_v18  ;;  %v2185_v26 = vpop.f32.mrb[19].mxu1 }
0x1161   :  { %v1607_v27 = vmax.f32 %v1604_v25, 0.0 }
0x1163   :  { %2191 = vmatmul.mubr.msk.f32.vlgmr.msra.gmra.mrb[18].mxu0 %vm157_vm3, %v1607_v27 }
0x1164   :  { %2378 = vmatpush3.bf16.msra.mxu0 %v2375_v21  ;;  %2201 = vmatprep.mubr.msk.f32.mxu0 %vm263_vm2, %v2644_v53  ;;  %v46_v53 = vld [vmem:[%s2869_s4 + $0x180] ss:$0 sm:$0xff] }
0x1165   :  { %2380 = vmatprep.subr.bf16.mxu0 %v2379_v28 }
0x1168   :  { %2382 = vmatpush3.bf16.msra.mxu0 %v2379_v28 }
0x116b   :  { %2202 = vmatmul.mubr.msk.f32.vlgmr.msra.gmra.mrb[20].mxu0 %vm263_vm2, %v2709_v52 }
0x116c   :  { %2204 = vmatprep.mubr.msk.f32.mxu0 %vm263_vm2, %v2773_v2 }
0x1236   :  { %v1677_v29 = vpop.f32.mrb[18].mxu0 }
0x1237   :  { %v1681_v18 = vadd.f32 %v1677_v29, %v2580_v5  ;;  %v2192_v30 = vpop.f32.mrb[19].mxu0 }
0x1239   :  { %v1682_v32 = vadd.f32 %v1681_v18, %v2791_v47 }
0x123b   :  { %v1683_v12 = vmul.f32 %v1682_v32, %v2632_v36 }
0x123d   :  { %2406 = vtanh.f32 %v1683_v12 }
0x123e   :  { %v2203_v33 = vpop.f32.mrb[20].mxu0 }
0x123f   :  { %v1782_v34 = vadd.f32 %v2203_v33, %v46_v53  ;;  %v1776_v6 = vpop.f32.mrb[21].mxu0 }
0x1240   :  { %v1777_v52 = vadd.f32 %v1776_v6, %v46_v53 }
0x1241   :  { %1796 = vst [vmem:[%s2874_s5 + $0x8] sm:$0xff] %v1782_v34 }
0x1242   :  { %1795 = vst [vmem:[%s2874_s5] sm:$0xff] %v1777_v52 }
0x1247   :  { %v2407_v5 = vpop.eup %2406 }
0x1248   :  { %v1685_v35 = vmul.f32 0.5, %v2407_v5 }
0x124a   :  { %v1686_v36 = vadd.f32 0.5, %v1685_v35 }
0x124c   :  { %v1687_v37 = vsel %vm2626_vm7, %v2407_v5, %v1686_v36 }
0x124d   :  { %1690 = vrot.lane.b32.xlu1 %v1687_v37, %s2414_s7  ;;  %v1688_v39 = vmul.f32 %v1687_v37, %v2768_v42 }
0x12bf   :  { %v1691_v38 = vpop.permute.xlu1 %1690 }
0x12c0   :  { %v1693_v9 = vmul.f32 %v1691_v38, %v1687_v37 }
0x12c2   :  { %1695 = vrot.lane.b32.xlu0 %v1693_v9, %s2416_s9 }
0x1334   :  { %v1696_v14 = vpop.permute.xlu0 %1695 }
0x1335   :  { %v1698_v16 = vadd.f32 %v1696_v14, %v1688_v39 }
0x1337   :  { %2408 = vtanh.f32 %v1698_v16 }
0x1341   :  { %v2409_v8 = vpop.eup %2408 }
0x1342   :  { %1701 = vrot.lane.b32.xlu1 %v2409_v8, %s2414_s7 }
0x1346   :  { %1800 = vrot.lane.b32.xlu1 %v1698_v16, %s2414_s7 }
0x13b4   :  { %v1702_v41 = vpop.permute.xlu1 %1701 }
0x13b5   :  { %v1704_v43 = vmul.f32 %v1702_v41, %v1687_v37 }
0x13b7   :  { %1706 = vrot.lane.b32.xlu0 %v1704_v43, %s2416_s9 }
0x13b8   :  { %v1801_v31 = vpop.permute.xlu1 %1800 }
0x13bb   :  { %1802 = vrot.lane.b32.xlu0 %v1801_v31, %s2416_s9 }
0x1429   :  { %v1707_v44 = vpop.permute.xlu0 %1706 }
0x142a   :  { %1806 = vst.msk [vmem:[%s2875_s6] sm:$0xff] %vm263_vm2, %v1707_v44  ;;  %2205 = vmatmul.mubr.msk.f32.gmra.mrb[22].mxu0 %vm263_vm2, %v1707_v44 }
0x142d   :  { %v1803_v42 = vpop.permute.xlu0 %1802 }
0x142e   :  { %1807 = vst.msk [vmem:[%s2875_s6 + $0x8] sm:$0xff] %vm263_vm2, %v1803_v42 }
0x14fd   :  { %v2206_v45 = vpop.f32.mrb[22].mxu0 }
0x14fe   :  { %v1792_v2 = vadd.f32 %v2206_v45, %v46_v53  ;;  %v1786_v46 = vpop.f32.mrb[23].mxu0 }
0x14ff   :  { %v1787_v40 = vadd.f32 %v1786_v46, %v46_v53 }
0x1500   :  { %1798 = vst [vmem:[%s2874_s5 + $0x18] sm:$0xff] %v1792_v2 }
0x1501   :  { %1797 = vst [vmem:[%s2874_s5 + $0x10] sm:$0xff] %v1787_v40 }

</bundles_post_ra>
